<compile_context>
chip_gen: v7x
topology: tpu7x:2x2x1
jax: 0.10.0
libtpu: 0.0.40
codegen_flags: <defaults>
</compile_context>

<pallas_src>
import jax
import jax.numpy as jnp
from jax import lax
from jax.experimental import pallas as pl
from jax.experimental.pallas import tpu as pltpu


def _pick_channel_tile(B, C, HW, budget_bytes=8 << 20):
    """Largest channel tile (multiple of 8 dividing C, or C itself) within VMEM budget."""
    per_ch = 2 * 4 * (3 * HW)  # double-buffered f32 (Ct, 2HW) input + (Ct, HW) output
    valid = [d for d in range(1, C + 1) if C % d == 0 and (d % 8 == 0 or d == C)]
    fitting = [d for d in valid if d * per_ch <= budget_bytes] or [min(valid)]
    if B == 1:
        # keep >= 2 grid steps so both v7x TensorCores get work
        two_plus = [d for d in fitting if C // d >= 2]
        if two_plus:
            return max(two_plus)
    return max(fitting)


def _make_kernel(Ct, HW, W, use_mxu_flip):
    def kernel(*refs):
        if use_mxu_flip:
            x_ref, wb_ref, m_ref, r_ref, o_ref = refs
        else:
            x_ref, wb_ref, m_ref, o_ref = refs

        # Within-group input channel slabs, loaded once each (ref slices -> direct loads).
        slab0 = x_ref[0, 0, :, 0:HW]          # (Ct, HW)
        slab1 = x_ref[0, 0, :, HW:2 * HW]     # (Ct, HW)

        acc = jnp.zeros((Ct, HW), jnp.float32)
        t = 0
        for dh in (-1, 0, 1):
            for dw in (-1, 0, 1):
                # tap[p] must be slab[p + dh*W + dw] (zero outside the image); roll is
                # circular on the XLU, the combined boundary mask zeroes wrapped lanes.
                shift = (-(dh * W + dw)) % HW
                t0 = pltpu.roll(slab0, shift, 1) if shift else slab0
                t1 = pltpu.roll(slab1, shift, 1) if shift else slab1
                # weights already kw-reversed in the wrapper (output W-flip trick)
                tap = wb_ref[:, t:t + 1] * t0 + wb_ref[:, 9 + t:10 + t] * t1
                if (dh, dw) != (0, 0):
                    tap = tap * m_ref[t:t + 1, :]   # one mask multiply per (dh, dw)
                acc = acc + tap
                t += 1

        if use_mxu_flip:
            # Exact W-flip via 0/1 permutation matrix on the (otherwise idle) MXU.
            acc = jnp.dot(acc, r_ref[...],
                          preferred_element_type=jnp.float32,
                          precision=lax.Precision.HIGHEST)

        o_ref[0] = (acc + wb_ref[:, 18:19]).astype(o_ref.dtype)

    return kernel


def conv_merge_forward(x, weight, bias):
    """x: (B, 4, C, H, W); weight: (C, 2, 3, 3); bias: (C,). Returns (B, C, H*W)."""
    B, D, C, H, W = x.shape
    assert D == 4, "conv_merge forward requires D == 4"
    HW = H * W

    Ct = _pick_channel_tile(B, C, HW)
    # In-kernel MXU flip only when the (HW, HW) permutation matrix is small enough.
    use_mxu_flip = (HW * HW * 4) <= (4 << 20)

    # Free reshape exposing the group structure: output channel c uses the two
    # contiguous halves of x_r[:, 1, c, :] (unflipped), j in {0, 1}.
    x_r = x.reshape(B, 2, C, 2 * HW)

    # Tiny auxiliary inputs, built once in plain JAX (negligible HBM):
    # tap (dh, dw) uses weight[c, j, dh+1, 1-dw]  (kw reversed -> output W-flip).
    w_taps = weight[:, :, :, ::-1].reshape(C, 18).astype(jnp.float32)
    wb = jnp.concatenate([w_taps, bias.reshape(C, 1).astype(jnp.float32)], axis=1)  # (C, 19)

    # Combined (dh, dw) boundary masks on the flattened row-major spatial axis.
    pos = jnp.arange(HW, dtype=jnp.int32)
    row, col = pos // W, pos % W
    mask_rows = []
    for dh in (-1, 0, 1):
        for dw in (-1, 0, 1):
            ok = ((row + dh >= 0) & (row + dh < H) & (col + dw >= 0) & (col + dw < W))
            mask_rows.append(ok)
    masks = jnp.stack(mask_rows).astype(jnp.float32)  # (9, HW)

    operands = [x_r, wb, masks]
    in_specs = [
        pl.BlockSpec((1, 1, Ct, 2 * HW), lambda b, cb: (b, 1, cb, 0)),  # only d=2:4 half read
        pl.BlockSpec((Ct, 19), lambda b, cb: (cb, 0)),
        pl.BlockSpec((9, HW), lambda b, cb: (0, 0)),
    ]
    if use_mxu_flip:
        flip_idx = row * W + (W - 1 - col)
        flip_mat = (flip_idx[:, None] == jnp.arange(HW)[None, :]).astype(jnp.float32)  # (HW, HW)
        operands.append(flip_mat)
        in_specs.append(pl.BlockSpec((HW, HW), lambda b, cb: (0, 0)))

    # TODO(synk): the first self.merge(x[:, 0:2]...) call in the PyTorch forward is dead
    # code (immediately overwritten) and is intentionally not computed.
    # TODO(synk): for very large HW (e.g. 56x56 stages) chunk the lane axis in-kernel so
    # the accumulator stays vreg-resident; at the sizes used here acc fits in vregs.

    z = pl.pallas_call(
        _make_kernel(Ct, HW, W, use_mxu_flip),
        grid=(B, C // Ct),
        in_specs=in_specs,
        out_specs=pl.BlockSpec((1, Ct, HW), lambda b, cb: (b, cb, 0)),  # lane-dense output block
        out_shape=jax.ShapeDtypeStruct((B, C, HW), x.dtype),
        compiler_params=pltpu.CompilerParams(
            dimension_semantics=("parallel", "parallel"),
            vmem_limit_bytes=32 * 1024 * 1024),
    )(*operands)

    if not use_mxu_flip:
        # TODO(synk): when HW is too large for the in-kernel MXU flip, this reverse should
        # be fused into the downstream consumer instead of materializing here.
        z = z.reshape(B, C, H, W)[:, :, :, ::-1].reshape(B, C, HW)
    return z


def _reference_forward(x, weight, bias):
    """Pure-JAX reference mirroring the PyTorch module exactly."""
    B, D, C, H, W = x.shape
    merged = jnp.flip(x[:, 2:4], axis=-1).reshape(B, 2 * C, H, W)
    y = lax.conv_general_dilated(
        merged, weight, window_strides=(1, 1), padding=((1, 1), (1, 1)),
        dimension_numbers=("NCHW", "OIHW", "NCHW"), feature_group_count=C)
    y = y + bias[None, :, None, None]
    return y.reshape(B, C, H * W)


if __name__ == "__main__":
    B, C, H, W = 2, 4, 16, 16
    num_expand = 2
    D = 2 * num_expand  # forward's .view requires D == 4

    key = jax.random.PRNGKey(0)
    kx, kw, kb = jax.random.split(key, 3)
    x = jax.random.normal(kx, (B, D, C, H, W), dtype=jnp.float32)
    weight = 0.1 * jax.random.normal(kw, (C, C * num_expand // C, 3, 3), dtype=jnp.float32)  # (C, 2, 3, 3)
    bias = 0.1 * jax.random.normal(kb, (C,), dtype=jnp.float32)

    fwd = jax.jit(conv_merge_forward)
    out = jax.block_until_ready(fwd(x, weight, bias))

    ref = jax.block_until_ready(_reference_forward(x, weight, bias))
    assert out.shape == (B, C, H * W), out.shape
    assert jnp.allclose(out, ref, atol=1e-5, rtol=1e-5), float(jnp.max(jnp.abs(out - ref)))

    print("KERNEL_OK")
</pallas_src>

<mosaic_0001>
module attributes {stable_mosaic.version = 11 : i64} {
  func.func @kernel(%arg0: i32, %arg1: i32, %arg2: memref<1x1x4x512xf32, #tpu.memory_space<vmem>>, %arg3: memref<4x19xf32, #tpu.memory_space<vmem>>, %arg4: memref<9x256xf32, #tpu.memory_space<vmem>>, %arg5: memref<256x256xf32, #tpu.memory_space<vmem>>, %arg6: memref<1x4x256xf32, #tpu.memory_space<vmem>>) attributes {dimension_semantics = [#tpu.dimension_semantics<parallel>, #tpu.dimension_semantics<parallel>], iteration_bounds = array<i64: 2, 1>, scalar_prefetch = 0 : i64, scratch_operands = 0 : i64, tpu.core_type = #tpu.core_type<tc>, window_params = [{transform_indices = @transform_0, window_bounds = array<i64: 1, 1, 4, 512>}, {transform_indices = @transform_1, window_bounds = array<i64: 4, 19>}, {pipeline_mode = #tpu.pipeline_mode<synchronous>, transform_indices = @transform_2, window_bounds = array<i64: 9, 256>}, {pipeline_mode = #tpu.pipeline_mode<synchronous>, transform_indices = @transform_3, window_bounds = array<i64: 256, 256>}, {transform_indices = @transform_4, window_bounds = array<i64: 1, 4, 256>}]} {
    %c0 = arith.constant 0 : index
    %c0_0 = arith.constant 0 : index
    %c0_1 = arith.constant 0 : index
    %c0_2 = arith.constant 0 : index
    %0 = vector.load %arg2[%c0, %c0_0, %c0_1, %c0_2] : memref<1x1x4x512xf32, #tpu.memory_space<vmem>>, vector<1x1x4x256xf32>
    %1 = vector.shape_cast %0 : vector<1x1x4x256xf32> to vector<4x256xf32>
    %c0_3 = arith.constant 0 : index
    %c0_4 = arith.constant 0 : index
    %c0_5 = arith.constant 0 : index
    %c256 = arith.constant 256 : index
    %2 = vector.load %arg2[%c0_3, %c0_4, %c0_5, %c256] : memref<1x1x4x512xf32, #tpu.memory_space<vmem>>, vector<1x1x4x256xf32>
    %3 = vector.shape_cast %2 : vector<1x1x4x256xf32> to vector<4x256xf32>
    %cst = arith.constant 0.000000e+00 : f32
    %4 = vector.broadcast %cst : f32 to vector<4x256xf32>
    %c17_i32 = arith.constant 17 : i32
    %5 = tpu.dynamic_rotate %1 by %c17_i32 dim 1 : vector<4x256xf32>, i32 -> vector<4x256xf32>
    %c17_i32_6 = arith.constant 17 : i32
    %6 = tpu.dynamic_rotate %3 by %c17_i32_6 dim 1 : vector<4x256xf32>, i32 -> vector<4x256xf32>
    %c0_7 = arith.constant 0 : index
    %c0_8 = arith.constant 0 : index
    %7 = vector.load %arg3[%c0_7, %c0_8] : memref<4x19xf32, #tpu.memory_space<vmem>>, vector<4x1xf32>
    %8 = vector.broadcast %7 : vector<4x1xf32> to vector<4x256xf32>
    %9 = arith.mulf %8, %5 : vector<4x256xf32>
    %c0_9 = arith.constant 0 : index
    %c9 = arith.constant 9 : index
    %10 = vector.load %arg3[%c0_9, %c9] : memref<4x19xf32, #tpu.memory_space<vmem>>, vector<4x1xf32>
    %11 = vector.broadcast %10 : vector<4x1xf32> to vector<4x256xf32>
    %12 = arith.mulf %11, %6 : vector<4x256xf32>
    %13 = arith.addf %9, %12 : vector<4x256xf32>
    %c0_10 = arith.constant 0 : index
    %c0_11 = arith.constant 0 : index
    %14 = vector.load %arg4[%c0_10, %c0_11] : memref<9x256xf32, #tpu.memory_space<vmem>>, vector<1x256xf32>
    %15 = vector.broadcast %14 : vector<1x256xf32> to vector<4x256xf32>
    %16 = arith.mulf %13, %15 : vector<4x256xf32>
    %17 = arith.addf %4, %16 : vector<4x256xf32>
    %c16_i32 = arith.constant 16 : i32
    %18 = tpu.dynamic_rotate %1 by %c16_i32 dim 1 : vector<4x256xf32>, i32 -> vector<4x256xf32>
    %c16_i32_12 = arith.constant 16 : i32
    %19 = tpu.dynamic_rotate %3 by %c16_i32_12 dim 1 : vector<4x256xf32>, i32 -> vector<4x256xf32>
    %c0_13 = arith.constant 0 : index
    %c1 = arith.constant 1 : index
    %20 = vector.load %arg3[%c0_13, %c1] : memref<4x19xf32, #tpu.memory_space<vmem>>, vector<4x1xf32>
    %21 = vector.broadcast %20 : vector<4x1xf32> to vector<4x256xf32>
    %22 = arith.mulf %21, %18 : vector<4x256xf32>
    %c0_14 = arith.constant 0 : index
    %c10 = arith.constant 10 : index
    %23 = vector.load %arg3[%c0_14, %c10] : memref<4x19xf32, #tpu.memory_space<vmem>>, vector<4x1xf32>
    %24 = vector.broadcast %23 : vector<4x1xf32> to vector<4x256xf32>
    %25 = arith.mulf %24, %19 : vector<4x256xf32>
    %26 = arith.addf %22, %25 : vector<4x256xf32>
    %c1_15 = arith.constant 1 : index
    %c0_16 = arith.constant 0 : index
    %27 = vector.load %arg4[%c1_15, %c0_16] : memref<9x256xf32, #tpu.memory_space<vmem>>, vector<1x256xf32>
    %28 = vector.broadcast %27 : vector<1x256xf32> to vector<4x256xf32>
    %29 = arith.mulf %26, %28 : vector<4x256xf32>
    %30 = arith.addf %17, %29 : vector<4x256xf32>
    %c15_i32 = arith.constant 15 : i32
    %31 = tpu.dynamic_rotate %1 by %c15_i32 dim 1 : vector<4x256xf32>, i32 -> vector<4x256xf32>
    %c15_i32_17 = arith.constant 15 : i32
    %32 = tpu.dynamic_rotate %3 by %c15_i32_17 dim 1 : vector<4x256xf32>, i32 -> vector<4x256xf32>
    %c0_18 = arith.constant 0 : index
    %c2 = arith.constant 2 : index
    %33 = vector.load %arg3[%c0_18, %c2] : memref<4x19xf32, #tpu.memory_space<vmem>>, vector<4x1xf32>
    %34 = vector.broadcast %33 : vector<4x1xf32> to vector<4x256xf32>
    %35 = arith.mulf %34, %31 : vector<4x256xf32>
    %c0_19 = arith.constant 0 : index
    %c11 = arith.constant 11 : index
    %36 = vector.load %arg3[%c0_19, %c11] : memref<4x19xf32, #tpu.memory_space<vmem>>, vector<4x1xf32>
    %37 = vector.broadcast %36 : vector<4x1xf32> to vector<4x256xf32>
    %38 = arith.mulf %37, %32 : vector<4x256xf32>
    %39 = arith.addf %35, %38 : vector<4x256xf32>
    %c2_20 = arith.constant 2 : index
    %c0_21 = arith.constant 0 : index
    %40 = vector.load %arg4[%c2_20, %c0_21] : memref<9x256xf32, #tpu.memory_space<vmem>>, vector<1x256xf32>
    %41 = vector.broadcast %40 : vector<1x256xf32> to vector<4x256xf32>
    %42 = arith.mulf %39, %41 : vector<4x256xf32>
    %43 = arith.addf %30, %42 : vector<4x256xf32>
    %c1_i32 = arith.constant 1 : i32
    %44 = tpu.dynamic_rotate %1 by %c1_i32 dim 1 : vector<4x256xf32>, i32 -> vector<4x256xf32>
    %c1_i32_22 = arith.constant 1 : i32
    %45 = tpu.dynamic_rotate %3 by %c1_i32_22 dim 1 : vector<4x256xf32>, i32 -> vector<4x256xf32>
    %c0_23 = arith.constant 0 : index
    %c3 = arith.constant 3 : index
    %46 = vector.load %arg3[%c0_23, %c3] : memref<4x19xf32, #tpu.memory_space<vmem>>, vector<4x1xf32>
    %47 = vector.broadcast %46 : vector<4x1xf32> to vector<4x256xf32>
    %48 = arith.mulf %47, %44 : vector<4x256xf32>
    %c0_24 = arith.constant 0 : index
    %c12 = arith.constant 12 : index
    %49 = vector.load %arg3[%c0_24, %c12] : memref<4x19xf32, #tpu.memory_space<vmem>>, vector<4x1xf32>
    %50 = vector.broadcast %49 : vector<4x1xf32> to vector<4x256xf32>
    %51 = arith.mulf %50, %45 : vector<4x256xf32>
    %52 = arith.addf %48, %51 : vector<4x256xf32>
    %c3_25 = arith.constant 3 : index
    %c0_26 = arith.constant 0 : index
    %53 = vector.load %arg4[%c3_25, %c0_26] : memref<9x256xf32, #tpu.memory_space<vmem>>, vector<1x256xf32>
    %54 = vector.broadcast %53 : vector<1x256xf32> to vector<4x256xf32>
    %55 = arith.mulf %52, %54 : vector<4x256xf32>
    %56 = arith.addf %43, %55 : vector<4x256xf32>
    %c0_27 = arith.constant 0 : index
    %c4 = arith.constant 4 : index
    %57 = vector.load %arg3[%c0_27, %c4] : memref<4x19xf32, #tpu.memory_space<vmem>>, vector<4x1xf32>
    %58 = vector.broadcast %57 : vector<4x1xf32> to vector<4x256xf32>
    %59 = arith.mulf %58, %1 : vector<4x256xf32>
    %c0_28 = arith.constant 0 : index
    %c13 = arith.constant 13 : index
    %60 = vector.load %arg3[%c0_28, %c13] : memref<4x19xf32, #tpu.memory_space<vmem>>, vector<4x1xf32>
    %61 = vector.broadcast %60 : vector<4x1xf32> to vector<4x256xf32>
    %62 = arith.mulf %61, %3 : vector<4x256xf32>
    %63 = arith.addf %59, %62 : vector<4x256xf32>
    %64 = arith.addf %56, %63 : vector<4x256xf32>
    %c255_i32 = arith.constant 255 : i32
    %65 = tpu.dynamic_rotate %1 by %c255_i32 dim 1 : vector<4x256xf32>, i32 -> vector<4x256xf32>
    %c255_i32_29 = arith.constant 255 : i32
    %66 = tpu.dynamic_rotate %3 by %c255_i32_29 dim 1 : vector<4x256xf32>, i32 -> vector<4x256xf32>
    %c0_30 = arith.constant 0 : index
    %c5 = arith.constant 5 : index
    %67 = vector.load %arg3[%c0_30, %c5] : memref<4x19xf32, #tpu.memory_space<vmem>>, vector<4x1xf32>
    %68 = vector.broadcast %67 : vector<4x1xf32> to vector<4x256xf32>
    %69 = arith.mulf %68, %65 : vector<4x256xf32>
    %c0_31 = arith.constant 0 : index
    %c14 = arith.constant 14 : index
    %70 = vector.load %arg3[%c0_31, %c14] : memref<4x19xf32, #tpu.memory_space<vmem>>, vector<4x1xf32>
    %71 = vector.broadcast %70 : vector<4x1xf32> to vector<4x256xf32>
    %72 = arith.mulf %71, %66 : vector<4x256xf32>
    %73 = arith.addf %69, %72 : vector<4x256xf32>
    %c5_32 = arith.constant 5 : index
    %c0_33 = arith.constant 0 : index
    %74 = vector.load %arg4[%c5_32, %c0_33] : memref<9x256xf32, #tpu.memory_space<vmem>>, vector<1x256xf32>
    %75 = vector.broadcast %74 : vector<1x256xf32> to vector<4x256xf32>
    %76 = arith.mulf %73, %75 : vector<4x256xf32>
    %77 = arith.addf %64, %76 : vector<4x256xf32>
    %c241_i32 = arith.constant 241 : i32
    %78 = tpu.dynamic_rotate %1 by %c241_i32 dim 1 : vector<4x256xf32>, i32 -> vector<4x256xf32>
    %c241_i32_34 = arith.constant 241 : i32
    %79 = tpu.dynamic_rotate %3 by %c241_i32_34 dim 1 : vector<4x256xf32>, i32 -> vector<4x256xf32>
    %c0_35 = arith.constant 0 : index
    %c6 = arith.constant 6 : index
    %80 = vector.load %arg3[%c0_35, %c6] : memref<4x19xf32, #tpu.memory_space<vmem>>, vector<4x1xf32>
    %81 = vector.broadcast %80 : vector<4x1xf32> to vector<4x256xf32>
    %82 = arith.mulf %81, %78 : vector<4x256xf32>
    %c0_36 = arith.constant 0 : index
    %c15 = arith.constant 15 : index
    %83 = vector.load %arg3[%c0_36, %c15] : memref<4x19xf32, #tpu.memory_space<vmem>>, vector<4x1xf32>
    %84 = vector.broadcast %83 : vector<4x1xf32> to vector<4x256xf32>
    %85 = arith.mulf %84, %79 : vector<4x256xf32>
    %86 = arith.addf %82, %85 : vector<4x256xf32>
    %c6_37 = arith.constant 6 : index
    %c0_38 = arith.constant 0 : index
    %87 = vector.load %arg4[%c6_37, %c0_38] : memref<9x256xf32, #tpu.memory_space<vmem>>, vector<1x256xf32>
    %88 = vector.broadcast %87 : vector<1x256xf32> to vector<4x256xf32>
    %89 = arith.mulf %86, %88 : vector<4x256xf32>
    %90 = arith.addf %77, %89 : vector<4x256xf32>
    %c240_i32 = arith.constant 240 : i32
    %91 = tpu.dynamic_rotate %1 by %c240_i32 dim 1 : vector<4x256xf32>, i32 -> vector<4x256xf32>
    %c240_i32_39 = arith.constant 240 : i32
    %92 = tpu.dynamic_rotate %3 by %c240_i32_39 dim 1 : vector<4x256xf32>, i32 -> vector<4x256xf32>
    %c0_40 = arith.constant 0 : index
    %c7 = arith.constant 7 : index
    %93 = vector.load %arg3[%c0_40, %c7] : memref<4x19xf32, #tpu.memory_space<vmem>>, vector<4x1xf32>
    %94 = vector.broadcast %93 : vector<4x1xf32> to vector<4x256xf32>
    %95 = arith.mulf %94, %91 : vector<4x256xf32>
    %c0_41 = arith.constant 0 : index
    %c16 = arith.constant 16 : index
    %96 = vector.load %arg3[%c0_41, %c16] : memref<4x19xf32, #tpu.memory_space<vmem>>, vector<4x1xf32>
    %97 = vector.broadcast %96 : vector<4x1xf32> to vector<4x256xf32>
    %98 = arith.mulf %97, %92 : vector<4x256xf32>
    %99 = arith.addf %95, %98 : vector<4x256xf32>
    %c7_42 = arith.constant 7 : index
    %c0_43 = arith.constant 0 : index
    %100 = vector.load %arg4[%c7_42, %c0_43] : memref<9x256xf32, #tpu.memory_space<vmem>>, vector<1x256xf32>
    %101 = vector.broadcast %100 : vector<1x256xf32> to vector<4x256xf32>
    %102 = arith.mulf %99, %101 : vector<4x256xf32>
    %103 = arith.addf %90, %102 : vector<4x256xf32>
    %c239_i32 = arith.constant 239 : i32
    %104 = tpu.dynamic_rotate %1 by %c239_i32 dim 1 : vector<4x256xf32>, i32 -> vector<4x256xf32>
    %c239_i32_44 = arith.constant 239 : i32
    %105 = tpu.dynamic_rotate %3 by %c239_i32_44 dim 1 : vector<4x256xf32>, i32 -> vector<4x256xf32>
    %c0_45 = arith.constant 0 : index
    %c8 = arith.constant 8 : index
    %106 = vector.load %arg3[%c0_45, %c8] : memref<4x19xf32, #tpu.memory_space<vmem>>, vector<4x1xf32>
    %107 = vector.broadcast %106 : vector<4x1xf32> to vector<4x256xf32>
    %108 = arith.mulf %107, %104 : vector<4x256xf32>
    %c0_46 = arith.constant 0 : index
    %c17 = arith.constant 17 : index
    %109 = vector.load %arg3[%c0_46, %c17] : memref<4x19xf32, #tpu.memory_space<vmem>>, vector<4x1xf32>
    %110 = vector.broadcast %109 : vector<4x1xf32> to vector<4x256xf32>
    %111 = arith.mulf %110, %105 : vector<4x256xf32>
    %112 = arith.addf %108, %111 : vector<4x256xf32>
    %c8_47 = arith.constant 8 : index
    %c0_48 = arith.constant 0 : index
    %113 = vector.load %arg4[%c8_47, %c0_48] : memref<9x256xf32, #tpu.memory_space<vmem>>, vector<1x256xf32>
    %114 = vector.broadcast %113 : vector<1x256xf32> to vector<4x256xf32>
    %115 = arith.mulf %112, %114 : vector<4x256xf32>
    %116 = arith.addf %103, %115 : vector<4x256xf32>
    %c0_49 = arith.constant 0 : index
    %c0_50 = arith.constant 0 : index
    %117 = vector.load %arg5[%c0_49, %c0_50] : memref<256x256xf32, #tpu.memory_space<vmem>>, vector<256x256xf32>
    %cst_51 = arith.constant dense<0.000000e+00> : vector<4x256xf32>
    %118 = tpu.matmul %116, %117, %cst_51 {dimension_numbers = #tpu.dot_dimension_numbers<[1], [0], [0], [1], [0, 0, 1, 1], [], []>, precision = #tpu.contract_precision<fp32>} : vector<4x256xf32>, vector<256x256xf32>, vector<4x256xf32> -> vector<4x256xf32>
    %c0_52 = arith.constant 0 : index
    %c18 = arith.constant 18 : index
    %119 = vector.load %arg3[%c0_52, %c18] : memref<4x19xf32, #tpu.memory_space<vmem>>, vector<4x1xf32>
    %120 = vector.broadcast %119 : vector<4x1xf32> to vector<4x256xf32>
    %121 = arith.addf %118, %120 : vector<4x256xf32>
    %c0_53 = arith.constant 0 : index
    %c0_54 = arith.constant 0 : index
    %c0_55 = arith.constant 0 : index
    %122 = vector.load %arg6[%c0_53, %c0_54, %c0_55] : memref<1x4x256xf32, #tpu.memory_space<vmem>>, vector<1x4x256xf32>
    %123 = vector.shape_cast %122 : vector<1x4x256xf32> to vector<4x256xf32>
    %124 = vector.shape_cast %121 : vector<4x256xf32> to vector<1x4x256xf32>
    tpu.vector_store %arg6[%c0_53, %c0_54, %c0_55], %124 {strides = array<i32>} : memref<1x4x256xf32, #tpu.memory_space<vmem>>, vector<1x4x256xf32>,
    return
  }
  func.func @transform_0(%arg0: i32, %arg1: i32) -> (i32, i32, i32, i32) {
    %c1_i32 = arith.constant 1 : i32
    %c0_i32 = arith.constant 0 : i32
    %c0_i32_0 = arith.constant 0 : i32
    return %arg0, %c1_i32, %arg1, %c0_i32 : i32, i32, i32, i32
  }
  func.func @transform_1(%arg0: i32, %arg1: i32) -> (i32, i32) {
    %c0_i32 = arith.constant 0 : i32
    %c0_i32_0 = arith.constant 0 : i32
    return %arg1, %c0_i32 : i32, i32
  }
  func.func @transform_2(%arg0: i32, %arg1: i32) -> (i32, i32) {
    %c0_i32 = arith.constant 0 : i32
    %c0_i32_0 = arith.constant 0 : i32
    %c0_i32_1 = arith.constant 0 : i32
    return %c0_i32, %c0_i32_0 : i32, i32
  }
  func.func @transform_3(%arg0: i32, %arg1: i32) -> (i32, i32) {
    %c0_i32 = arith.constant 0 : i32
    %c0_i32_0 = arith.constant 0 : i32
    %c0_i32_1 = arith.constant 0 : i32
    return %c0_i32, %c0_i32_0 : i32, i32
  }
  func.func @transform_4(%arg0: i32, %arg1: i32) -> (i32, i32, i32) {
    %c0_i32 = arith.constant 0 : i32
    %c0_i32_0 = arith.constant 0 : i32
    return %arg0, %arg1, %c0_i32 : i32, i32, i32
  }
}

</mosaic_0001>

<bundles_post_ra>
// kernel: conv_merge_forward.1
= control target key start
LH: loop header
LB: loop body
LE: loop exit
PB: predicated region body
PF: predicated region fallthrough
CT: control target
= control target key end

     0   :  { %9 = vsyncpa [#allocation3], 0  ;;  %s4036_s0 = inlined_call_operand.vmem [shape: f32[2,2,4,512], index: 0, kind: input, shape index: {}]   ;;  %s4037_s1 = inlined_call_operand.vmem [shape: f32[4,19], index: 1, kind: input, shape index: {}]   ;;  %s4038_s2 = inlined_call_operand.vmem [shape: f32[9,256], index: 2, kind: input, shape index: {}]   ;;  %s4039_s3 = inlined_call_operand.vmem [shape: f32[256,256], index: 3, kind: input, shape index: {}]   ;;  %s4040_s4 = inlined_call_operand.hbm [shape: f32[2,4,256], index: 4, kind: output, shape index: {}]  }
   0x1   :  { %11 = vsyncpa [#allocation3 + $0x1], 0  ;;  %s2771_s15 = smov 0   ;;  %s2773_s16 = smov 0  }
   0x2   :  { %s2775_s17 = smov 0   ;;  %s2777_s18 = smov 0  }
   0x3   :  { %s2779_s19 = smov 0   ;;  %s2781_s20 = smov 0  }
   0x4 LB: > { %s2110_s21 = sadd.s32 4294967295, %s2716_s20   ;;  %s2111_s22 = sadd.s32 4294967294, %s2716_s20   ;;  %s2716_s20 = sphi %s2781_s20, %s17_s20   ;;  %s2712_s19 = sphi %s2779_s19, %s4451_s19   ;;  %s2708_s18 = sphi %s2777_s18, %s4450_s18   ;;  %s2704_s17 = sphi %s2775_s17, %s4449_s17   ;;  %s2700_s16 = sphi %s2773_s16, %s4448_s16   ;;  %s2696_s15 = sphi %s2771_s15, %s4447_s15  }
   0x5   : > { %s29_s23 = sadd.s32 1, %s2712_s19  ;;  %s134_s24 = sadd.s32 1, %s2704_s17 }
   0x6   : > { %p31_p0 = scmp.ge.s32.totalorder %s29_s23, 2  ;;  %p144_p1 = scmp.ne.s32.totalorder %s2704_s17, %s2700_s16 }
   0x7   : > { %p145_p2 = scmp.eq.s32.totalorder %s2110_s21, 1  ;;  %p150_p3 = scmp.ne.s32.totalorder %s2700_s16, %s2696_s15 }
   0x8   : > { %s4453_s23 = smov (%p31_p0, %s29_s23), 0  ;;  %p151_p5 = scmp.eq.s32.totalorder %s2111_s22, 1 }
   0x9   : > { %p2811_p4 = por %p145_p2, %p144_p1  ;;  %s129_s26 = ssub.s32 %s2712_s19, %s4453_s23 }
   0xa   : > { %p2115_p6 = scmp.ge.s32.totalorder %s2716_s20, 1  ;;  %p132_p7 = scmp.eq.s32.totalorder %s129_s26, 0 }
   0xb   : > { %p2818_p8 = por %p151_p5, %p150_p3  ;;  %p195_p9 = scmp.lt.s32.totalorder %s2716_s20, 3 }
   0xc   : > { %s2824_s28 = scalar_select %p132_p7, %s2704_s17, %s134_s24  }
   0xd   : > { %p196_p10 = pnand %p2115_p6, %p195_p9 }
   0xf   : > { %199 = sbr.rel (%p196_p10) target bundleno = 647 (0x287), region = 36 }
  0x16   : > { %v312_v0 = vld [vmem:[%s4037_s1] sm:$0xf]  ;;  %v2718_v1 = vmov 1   ;;  %v2719_v2 = vmov 0   ;;  %p230_p11 = scmp.lt.s32.totalorder %s2708_s18, 1  ;;  %v2720_v4 = vmov 10  }
  0x17   : > { %2615 = vset.pattern.permute.xlu1 %v2718_v1  ;;  %2613 = vset.pattern.permute.xlu0 %v2719_v2  ;;  %v267_v3 = vld [vmem:[%s4037_s1] sm:$0xf]  ;;  %v2721_v5 = vmov 9   ;;  %v2722_v7 = vmov 2   ;;  %v2723_v8 = vmov 11   ;;  %v2724_v11 = vmov 3  }
  0x18   : > { %315 = vperm.xlu1 %2615, %v312_v0   ;;  %270 = vperm.xlu0 %2613, %v267_v3   ;;  %s231_s7 = scalar_select %p230_p11, %s2708_s18, 1  ;;  %v358_v6 = vld [vmem:[%s4037_s1] sm:$0xf]  ;;  %v2726_v12 = vmov 4   ;;  %v2727_v14 = vmov 12   ;;  %v2729_v17 = vmov 13  }
  0x19   : > { %v404_v9 = vld [vmem:[%s4037_s1] sm:$0xf]  ;;  %s2725_s22 = smov 17   ;;  %s2728_s24 = smov 16   ;;  %v2731_v19 = vmov 14   ;;  %v2733_v21 = vmov 6  }
  0x1a   : > { %s2133_s10 = sshll.u32 %s231_s7, 5  ;;  %s2730_s26 = smov 15   ;;  %v468_v18 = vld [vmem:[%s4037_s1] sm:$0xf]  ;;  %v2734_v23 = vmov 5   ;;  %v2735_v25 = vmov 16  }
  0x1b   : > { %s2840_s13 = scalar_lea.vmem %s4036_s0, %s2133_s10  ;;  %v443_v20 = vld [vmem:[%s4037_s1] sm:$0xf]  ;;  %s2732_s7 = smov 1   ;;  %v2736_v26 = vmov 15   ;;  %v2895_v27 = vld [vmem:[%s4039_s3 + $0x8] sm:$0xff]  ;;  %v2900_v28 = vld [vmem:[%s4039_s3 + $0x18] sm:$0xff] }
  0x1c   : > { %2616 = vset.pattern.permute.xlu1 %v2720_v4  ;;  %2614 = vset.pattern.permute.xlu0 %v2721_v5  ;;  %v2846_v10 = vld [vmem:[%s2840_s13 + $0x10] sm:$0xff]  ;;  %v2850_v13 = vld [vmem:[%s2840_s13 + $0x18] sm:$0xff]  ;;  %v514_v22 = vld [vmem:[%s4037_s1] sm:$0xf]  ;;  %s2737_s12 = smov 127   ;;  %v2738_v29 = vmov 8  }
  0x1d   : > { %321 = vperm.xlu1 %2616, %v312_v0   ;;  %276 = vperm.xlu0 %2614, %v267_v3   ;;  %v2855_v15 = vcombine.high %v2846_v10, %v2846_v10  ;;  %v2861_v16 = vcombine.high %v2850_v13, %v2850_v13  ;;  %v2885_v24 = vld [vmem:[%s4037_s1] sm:$0xf]  ;;  %v4042_v31 = vand.u32 4294901760, %v2895_v27  ;;  %v4041_v32 = vand.u32 4294901760, %v2900_v28  ;;  %v641_v34 = vld [vmem:[%s4039_s3 + $0x10] sm:$0xff]  ;;  %v644_v39 = vld [vmem:[%s4039_s3 + $0x28] sm:$0xff] }
  0x1e   : > { %v2907_v30 = vld [vmem:[%s4037_s1] sm:$0xf]  ;;  %v713_v36 = vand.u32 4294901760, %v641_v34  ;;  %v646_v40 = vld [vmem:[%s4039_s3 + $0x38] sm:$0xff]  ;;  %v715_v41 = vand.u32 4294901760, %v644_v39  ;;  %v645_v44 = vld [vmem:[%s4039_s3 + $0x30] sm:$0xff] }
  0x1f   : > { %v639_v33 = vld [vmem:[%s4039_s3] sm:$0xff]  ;;  %v2921_v37 = vpack.c.bf16 %v4041_v32, %v4042_v31  ;;  %v719_v42 = vand.u32 4294901760, %v646_v40  ;;  %v721_v46 = vand.u32 4294901760, %v645_v44  ;;  %v648_v49 = vld [vmem:[%s4039_s3 + $0x48] sm:$0xff]  ;;  %v650_v50 = vld [vmem:[%s4039_s3 + $0x58] sm:$0xff]  ;;  %v2740_v62 = vmov 7  }
  0x20   : > { %v709_v35 = vand.u32 4294901760, %v639_v33  ;;  %v643_v43 = vld [vmem:[%s4039_s3 + $0x20] sm:$0xff]  ;;  %v723_v51 = vand.u32 4294901760, %v648_v49  ;;  %v727_v52 = vand.u32 4294901760, %v650_v50  ;;  %v649_v54 = vld [vmem:[%s4039_s3 + $0x50] sm:$0xff]  ;;  %v2972_v59 = vsub.f32 %v641_v34, %v713_v36  ;;  %v652_v60 = vld [vmem:[%s4039_s3 + $0x68] sm:$0xff] }
  0x21   : > { %2617 = vset.pattern.permute.xlu1 %v2722_v7  ;;  %2618 = vset.pattern.permute.xlu0 %v2723_v8  ;;  %4158 = vst [vmem:[#allocation5_spill] sm:$0xff] %v2921_v37  ;;  %v717_v45 = vand.u32 4294901760, %v643_v43  ;;  %v2943_v47 = vpack.c.bf16 %v719_v42, %v715_v41  ;;  %v647_v53 = vld [vmem:[%s4039_s3 + $0x40] sm:$0xff]  ;;  %v729_v56 = vand.u32 4294901760, %v649_v54  ;;  %v654_v61 = vld [vmem:[%s4039_s3 + $0x78] sm:$0xff]  ;;  %v2980_v63 = vsub.f32 %v644_v39, %v715_v41  ;;  %v653_v4 = vld [vmem:[%s4039_s3 + $0x70] sm:$0xff] }
  0x22   : > { %361 = vperm.xlu1 %2617, %v358_v6   ;;  %367 = vperm.xlu0 %2618, %v358_v6   ;;  %v2924_v38 = vpack.c.bf16 %v713_v36, %v709_v35  ;;  %v725_v55 = vand.u32 4294901760, %v647_v53  ;;  %v2965_v57 = vpack.c.bf16 %v727_v52, %v723_v51  ;;  %v2970_v58 = vsub.f32 %v639_v33, %v709_v35  ;;  %v651_v3 = vld [vmem:[%s4039_s3 + $0x60] sm:$0xff]  ;;  %s2741_s6 = smov 112   ;;  %s2743_s14 = smov 111   ;;  %v672_v31 = vld [vmem:[%s4039_s3 + $0x108] sm:$0xff] }
  0x23   : > { %2328 = vmatprep.subr.bf16.mxu0 %v2921_v37  ;;  %2136 = vmatprep.subr.bf16.mxu1 %v2921_v37  ;;  %4160 = vst [vmem:[#allocation7_spill] sm:$0xff] %v2943_v47  ;;  %v2948_v48 = vpack.c.bf16 %v721_v46, %v717_v45  ;;  %4164 = vst [vmem:[#allocation11_spill] sm:$0xff] %v2972_v59  ;;  %v2982_v0 = vsub.f32 %v646_v40, %v719_v42  ;;  %v731_v8 = vand.u32 4294901760, %v652_v60  ;;  %v2742_v35 = vmov 17   ;;  %v684_v37 = vld [vmem:[%s4039_s3 + $0x168] sm:$0xff] }
  0x24   : > { %4159 = vst [vmem:[#allocation6_spill] sm:$0xff] %v2924_v38  ;;  %2330 = vmatpush1.bf16.msra.mxu0 %v2924_v38  ;;  %2138 = vmatpush1.bf16.msra.mxu1 %v2924_v38  ;;  %4162 = vst [vmem:[#allocation9_spill] sm:$0xff] %v2965_v57  ;;  %v2984_v1 = vsub.f32 %v643_v43, %v717_v45  ;;  %v2986_v2 = vsub.f32 %v645_v44, %v721_v46  ;;  %v660_v43 = vld [vmem:[%s4039_s3 + $0xa8] sm:$0xff]  ;;  %v662_v44 = vld [vmem:[%s4039_s3 + $0xb8] sm:$0xff] }
  0x25   : > { %4161 = vst [vmem:[#allocation8_spill] sm:$0xff] %v2948_v48  ;;  %2332 = vmatprep.subr.bf16.mxu0 %v2943_v47  ;;  %2140 = vmatprep.subr.bf16.mxu1 %v2943_v47  ;;  %4163 = vst [vmem:[#allocation10_spill] sm:$0xff] %v2970_v58  ;;  %v2995_v5 = vsub.f32 %v648_v49, %v723_v51  ;;  %v2997_v6 = vsub.f32 %v650_v50, %v727_v52  ;;  %v747_v46 = vand.u32 4294901760, %v660_v43  ;;  %v659_v50 = vld [vmem:[%s4039_s3 + $0xa0] sm:$0xff]  ;;  %v661_v51 = vld [vmem:[%s4039_s3 + $0xb0] sm:$0xff] }
  0x26   : > { %2619 = vset.pattern.permute.xlu1 %v2724_v11  ;;  %249 = vrot.lane.b32.xlu0 %v2846_v10, %s2725_s22  ;;  %4165 = vst [vmem:[#allocation12_spill] sm:$0xff] %v2980_v63  ;;  %4166 = vst [vmem:[#allocation13_spill] sm:$0xff] %v2982_v0  ;;  %v3000_v7 = vpack.c.bf16 %v729_v56, %v725_v55  ;;  %v3004_v11 = vsub.f32 %v649_v54, %v729_v56  ;;  %v751_v49 = vand.u32 4294901760, %v662_v44 }
  0x27   : > { %407 = vperm.xlu1 %2619, %v404_v9   ;;  %2621 = vset.pattern.permute.xlu0 %v2726_v12  ;;  %4167 = vst [vmem:[#allocation14_spill] sm:$0xff] %v2984_v1  ;;  %4168 = vst [vmem:[#allocation15_spill] sm:$0xff] %v2986_v2  ;;  %v735_v12 = vand.u32 4294901760, %v654_v61  ;;  %v749_v52 = vand.u32 4294901760, %v659_v50 }
  0x28   : > { %2334 = vmatpush1.bf16.msra.mxu0 %v2948_v48  ;;  %2142 = vmatpush1.bf16.msra.mxu1 %v2948_v48  ;;  %4169 = vst [vmem:[#allocation16_spill] sm:$0xff] %v2995_v5  ;;  %4170 = vst [vmem:[#allocation17_spill] sm:$0xff] %v2997_v6  ;;  %v3070_v56 = vpack.c.bf16 %v751_v49, %v747_v46 }
  0x29   : > { %2336 = vmatprep.subr.bf16.mxu0 %v2965_v57  ;;  %4171 = vst [vmem:[#allocation18_spill] sm:$0xff] %v3000_v7  ;;  %4173 = vst [vmem:[#allocation20_spill] sm:$0xff] %v3004_v11  ;;  %2144 = vmatprep.subr.bf16.mxu1 %v2965_v57 }
  0x2a   : > { %261 = vrot.lane.b32.xlu0 %v2850_v13, %s2725_s22  ;;  %4186 = vst [vmem:[#allocation33_spill] sm:$0xff] %v3070_v56 }
  0x2b   : > { %2620 = vset.pattern.permute.xlu1 %v2727_v14  ;;  %v733_v14 = vand.u32 4294901760, %v651_v3 }
  0x2c   : > { %413 = vperm.xlu1 %2620, %v404_v9   ;;  %2338 = vmatpush1.bf16.msra.mxu0 %v3000_v7 }
  0x2d   : > { %2146 = vmatpush1.bf16.msra.mxu1 %v3000_v7  ;;  %v679_v7 = vld [vmem:[%s4039_s3 + $0x140] sm:$0xff] }
  0x2e   : > { %299 = vrot.lane.b32.xlu0 %v2846_v10, %s2728_s24  ;;  %v789_v57 = vand.u32 4294901760, %v679_v7 }
  0x30   : > { %251 = vrot.lane.b32.xlu1 %v2855_v15, %s2725_s22 }
  0x31   : > { %2622 = vset.pattern.permute.xlu1 %v2729_v17  ;;  %v3010_v17 = vsub.f32 %v652_v60, %v731_v8  ;;  %v3072_v60 = vsub.f32 %v660_v43, %v747_v46  ;;  %v669_v43 = vld [vmem:[%s4039_s3 + $0xf0] sm:$0xff] }
  0x32   : > { %306 = vrot.lane.b32.xlu0 %v2850_v13, %s2728_s24  ;;  %v769_v46 = vand.u32 4294901760, %v669_v43 }
  0x33   : > { %4174 = vst [vmem:[#allocation21_spill] sm:$0xff] %v3010_v17  ;;  %4187 = vst [vmem:[#allocation34_spill] sm:$0xff] %v3072_v60 }
  0x34   : > { %263 = vrot.lane.b32.xlu1 %v2861_v16, %s2725_s22  ;;  %s227_s22 = sand.u32 1, %s2700_s16  }
  0x35   : > { %s1997_s10 = scalar_lea.sflag [#allocation3], %s227_s22 }
  0x36   : > { %345 = vrot.lane.b32.xlu0 %v2846_v10, %s2730_s26 }
  0x38   : > { %301 = vrot.lane.b32.xlu1 %v2855_v15, %s2728_s24 }
  0x3a   : > { %352 = vrot.lane.b32.xlu0 %v2850_v13, %s2730_s26 }
  0x3c   : > { %308 = vrot.lane.b32.xlu1 %v2861_v16, %s2728_s24  ;;  %s2116_s24 = sshll.u32 %s227_s22, 3 }
  0x3d   : > { %s229_s29 = scalar_lea.vmem [#allocation2], %s2116_s24 }
  0x3e   : > { %438 = vperm.xlu0 %2621, %v404_v9   ;;  %v3002_v9 = vsub.f32 %v647_v53, %v725_v55  ;;  %v753_v53 = vand.u32 4294901760, %v661_v51  ;;  %s2013_s30 = sshll.u32 %s229_s29, 4  ;;  %s3991_s30 = int_to_ptr.vmem [resolvable:$true] %s2013_s30 }
  0x40   : > { %347 = vrot.lane.b32.xlu1 %v2855_v15, %s2730_s26  ;;  %4172 = vst [vmem:[#allocation19_spill] sm:$0xff] %v3002_v9 }
  0x42   : > { %2624 = vset.pattern.permute.xlu0 %v2731_v19  ;;  %v656_v19 = vld [vmem:[%s4039_s3 + $0x88] sm:$0xff] }
  0x43   : > { %477 = vperm.xlu0 %2624, %v468_v18  }
  0x44   : > { %354 = vrot.lane.b32.xlu1 %v2861_v16, %s2730_s26  ;;  %s2134_s26 = sshll.u32 %s2708_s18, 7  ;;  %s2745_s18 = smov [#allocation2]  }
  0x45   : > { %s3989_s9 = scalar_lea.hbm %s4040_s4, %s2134_s26  ;;  %s2642_s11 = sshll.u32 %s2745_s18, 4  ;;  %s2643_s11 = int_to_ptr.vmem [resolvable:$false] %s2642_s11 }
  0x46   : > { %p2645_p1 = scmp.lt.s32.totalorder %s3991_s30, %s2643_s11 }
  0x47   : > { %398 = vrot.lane.b32.xlu0 %v2850_v13, %s2732_s7 }
  0x48   : > { %446 = vperm.xlu1 %2622, %v443_v20   ;;  %2625 = vset.pattern.permute.xlu0 %v2733_v21  ;;  %v658_v20 = vld [vmem:[%s4039_s3 + $0x98] sm:$0xff]  ;;  %v3018_v21 = vpack.c.bf16 %v735_v12, %v731_v8 }
  0x49   : > { %v743_v34 = vand.u32 4294901760, %v658_v20 }
  0x4a   : > { %4175 = vst [vmem:[#allocation22_spill] sm:$0xff] %v3018_v21  ;;  %2340 = vmatprep.subr.bf16.mxu0 %v3018_v21  ;;  %2148 = vmatprep.subr.bf16.mxu1 %v3018_v21  ;;  %v680_v21 = vld [vmem:[%s4039_s3 + $0x148] sm:$0xff] }
  0x4b   : > { %517 = vperm.xlu0 %2625, %v514_v22   ;;  %v3045_v42 = vsub.f32 %v658_v20, %v743_v34 }
  0x4c   : > { %2623 = vset.pattern.permute.xlu1 %v2734_v23  ;;  %v3023_v23 = vsub.f32 %v651_v3, %v733_v14  ;;  %v666_v3 = vld [vmem:[%s4039_s3 + $0xd8] sm:$0xff] }
  0x4d   : > { %471 = vperm.xlu1 %2623, %v468_v18   ;;  %v737_v18 = vand.u32 4294901760, %v653_v4  ;;  %4182 = vst [vmem:[#allocation29_spill] sm:$0xff] %v3045_v42 }
  0x4e   : > { %4177 = vst [vmem:[#allocation24_spill] sm:$0xff] %v3023_v23 }
  0x4f   : > { %2628 = vset.pattern.permute.xlu0 %v2735_v25  ;;  %v655_v25 = vld [vmem:[%s4039_s3 + $0x80] sm:$0xff]  ;;  %v3035_v33 = vsub.f32 %v653_v4, %v737_v18  ;;  %v3087_v4 = vpack.c.bf16 %v753_v53, %v749_v52 }
  0x50   : > { %569 = vperm.xlu0 %2628, %v2885_v24   ;;  %v741_v39 = vand.u32 4294901760, %v655_v25 }
  0x51   : > { %391 = vrot.lane.b32.xlu1 %v2846_v10, %s2732_s7  ;;  %4179 = vst [vmem:[#allocation26_spill] sm:$0xff] %v3035_v33  ;;  %4189 = vst [vmem:[#allocation36_spill] sm:$0xff] %v3087_v4 }
  0x52   : > { %2626 = vset.pattern.permute.xlu1 %v2736_v26  ;;  %v657_v26 = vld [vmem:[%s4039_s3 + $0x90] sm:$0xff]  ;;  %v3066_v54 = vsub.f32 %v655_v25, %v741_v39 }
  0x53   : > { %v745_v40 = vand.u32 4294901760, %v657_v26 }
  0x54   : > { %462 = vrot.lane.b32.xlu0 %v2850_v13, %s2737_s12  ;;  %4184 = vst [vmem:[#allocation31_spill] sm:$0xff] %v3066_v54  ;;  %v4236_v54 = vand.u32 4294901760, %v2895_v27 }
  0x55   : > { %393 = vrot.lane.b32.xlu1 %v2855_v15, %s2732_s7  ;;  %2629 = vset.pattern.permute.xlu0 %v2738_v29  ;;  %v3033_v29 = vpack.c.bf16 %v737_v18, %v733_v14  ;;  %v3054_v45 = vpack.c.bf16 %v745_v40, %v741_v39  ;;  %v3068_v55 = vsub.f32 %v657_v26, %v745_v40  ;;  %v663_v14 = vld [vmem:[%s4039_s3 + $0xc0] sm:$0xff]  ;;  %v665_v18 = vld [vmem:[%s4039_s3 + $0xd0] sm:$0xff]  ;;  %v668_v26 = vld [vmem:[%s4039_s3 + $0xe8] sm:$0xff] }
  0x56   : > { %v761_v20 = vand.u32 4294901760, %v665_v18  ;;  %v667_v40 = vld [vmem:[%s4039_s3 + $0xe0] sm:$0xff]  ;;  %v3350_v42 = vsub.f32 %v2895_v27, %v4236_v54 }
  0x57   : > { %4178 = vst [vmem:[#allocation25_spill] sm:$0xff] %v3033_v29  ;;  %2342 = vmatpush1.bf16.msra.mxu0 %v3033_v29  ;;  %4183 = vst [vmem:[#allocation30_spill] sm:$0xff] %v3054_v45  ;;  %2150 = vmatpush1.bf16.msra.mxu1 %v3033_v29 }
  0x58   : > { %609 = vperm.xlu0 %2629, %v2907_v30   ;;  %4185 = vst [vmem:[#allocation32_spill] sm:$0xff] %v3068_v55  ;;  %4237 = vst [vmem:[#allocation83_spill] sm:$0xff] %v3350_v42 }
  0x59   : > { %400 = vrot.lane.b32.xlu1 %v2861_v16, %s2732_s7  ;;  %s2739_s7 = smov 113  }
  0x5c   : > { %503 = vrot.lane.b32.xlu0 %v2855_v15, %s2739_s7 }
  0x5d   : > { %523 = vperm.xlu1 %2626, %v514_v22   ;;  %v3020_v22 = vsub.f32 %v654_v61, %v735_v12  ;;  %v3077_v61 = vsub.f32 %v662_v44, %v751_v49  ;;  %v759_v12 = vand.u32 4294901760, %v666_v3  ;;  %v765_v44 = vand.u32 4294901760, %v667_v40 }
  0x5f   : > { %4176 = vst [vmem:[#allocation23_spill] sm:$0xff] %v3020_v22  ;;  %4188 = vst [vmem:[#allocation35_spill] sm:$0xff] %v3077_v61  ;;  %v3125_v32 = vpack.c.bf16 %v769_v46, %v765_v44 }
  0x60   : > { %510 = vrot.lane.b32.xlu0 %v2861_v16, %s2739_s7 }
  0x61   : > { %2627 = vset.pattern.permute.xlu1 %v2740_v62  ;;  %v664_v62 = vld [vmem:[%s4039_s3 + $0xc8] sm:$0xff]  ;;  %4193 = vst [vmem:[#allocation40_spill] sm:$0xff] %v3125_v32 }
  0x62   : > { %563 = vperm.xlu1 %2627, %v2885_v24   ;;  %v739_v24 = vand.u32 4294901760, %v656_v19  ;;  %v755_v8 = vand.u32 4294901760, %v664_v62 }
  0x64   : > { %549 = vrot.lane.b32.xlu0 %v2855_v15, %s2741_s6  ;;  %v3038_v36 = vsub.f32 %v656_v19, %v739_v24  ;;  %v3043_v41 = vpack.c.bf16 %v743_v34, %v739_v24  ;;  %v757_v19 = vand.u32 4294901760, %v663_v14  ;;  %v3098_v24 = vpack.c.bf16 %v759_v12, %v755_v8  ;;  %v670_v34 = vld [vmem:[%s4039_s3 + $0xf8] sm:$0xff] }
  0x65   : > { %v767_v39 = vand.u32 4294901760, %v670_v34 }
  0x66   : > { %455 = vrot.lane.b32.xlu1 %v2846_v10, %s2737_s12  ;;  %4180 = vst [vmem:[#allocation27_spill] sm:$0xff] %v3038_v36  ;;  %4181 = vst [vmem:[#allocation28_spill] sm:$0xff] %v3043_v41  ;;  %2344 = vmatprep.subr.bf16.mxu0 %v3043_v41  ;;  %v3103_v25 = vpack.c.bf16 %v761_v20, %v757_v19  ;;  %v4238_v36 = vand.u32 4294901760, %v2900_v28 }
  0x67   : > { %2630 = vset.pattern.permute.xlu1 %v2742_v35  ;;  %2346 = vmatpush1.bf16.msra.mxu0 %v3054_v45  ;;  %4190 = vst [vmem:[#allocation37_spill] sm:$0xff] %v3098_v24  ;;  %v763_v35 = vand.u32 4294901760, %v668_v26 }
  0x68   : > { %556 = vrot.lane.b32.xlu0 %v2861_v16, %s2741_s6  ;;  %2152 = vmatprep.subr.bf16.mxu1 %v3043_v41  ;;  %4191 = vst [vmem:[#allocation38_spill] sm:$0xff] %v3103_v25  ;;  %v3136_v41 = vsub.f32 %v666_v3, %v759_v12  ;;  %v3159_v3 = vsub.f32 %v667_v40, %v765_v44  ;;  %v771_v12 = vand.u32 4294901760, %v672_v31  ;;  %v675_v40 = vld [vmem:[%s4039_s3 + $0x120] sm:$0xff] }
  0x69   : > { %2348 = vmatprep.subr.bf16.mxu0 %v3070_v56  ;;  %2154 = vmatpush1.bf16.msra.mxu1 %v3054_v45  ;;  %v3121_v49 = vpack.c.bf16 %v767_v39, %v763_v35  ;;  %v3132_v45 = vsub.f32 %v661_v51, %v753_v53  ;;  %v3149_v51 = vsub.f32 %v665_v18, %v761_v20  ;;  %v678_v20 = vld [vmem:[%s4039_s3 + $0x138] sm:$0xff] }
  0x6a   : > { %457 = vrot.lane.b32.xlu1 %v2855_v15, %s2737_s12  ;;  %2156 = vmatprep.subr.bf16.mxu1 %v3070_v56  ;;  %v3130_v56 = vsub.f32 %v659_v50, %v749_v52  ;;  %4197 = vst [vmem:[#allocation44_spill] sm:$0xff] %v3136_v41  ;;  %v3147_v50 = vsub.f32 %v663_v14, %v757_v19  ;;  %4202 = vst [vmem:[#allocation49_spill] sm:$0xff] %v3159_v3  ;;  %v676_v19 = vld [vmem:[%s4039_s3 + $0x128] sm:$0xff] }
  0x6b   : > { %2350 = vmatpush1.bf16.msra.mxu0 %v3087_v4  ;;  %4192 = vst [vmem:[#allocation39_spill] sm:$0xff] %v3121_v49  ;;  %4195 = vst [vmem:[#allocation42_spill] sm:$0xff] %v3132_v45  ;;  %v3151_v52 = vsub.f32 %v668_v26, %v763_v35  ;;  %v3153_v53 = vsub.f32 %v670_v34, %v767_v39  ;;  %v3171_v26 = vsub.f32 %v672_v31, %v771_v12  ;;  %v700_v45 = vld [vmem:[%s4039_s3 + $0x1e8] sm:$0xff] }
  0x6c   : > { %595 = vrot.lane.b32.xlu0 %v2855_v15, %s2743_s14  ;;  %2352 = vmatprep.subr.bf16.mxu0 %v3098_v24  ;;  %4194 = vst [vmem:[#allocation41_spill] sm:$0xff] %v3130_v56  ;;  %4198 = vst [vmem:[#allocation45_spill] sm:$0xff] %v3147_v50  ;;  %v779_v35 = vand.u32 4294901760, %v676_v19  ;;  %v783_v39 = vand.u32 4294901760, %v678_v20  ;;  %v781_v31 = vand.u32 4294901760, %v675_v40  ;;  %v702_v56 = vld [vmem:[%s4039_s3 + $0x1f8] sm:$0xff]  ;;  %v3355_v33 = vsub.f32 %v2900_v28, %v4238_v36 }
  0x6d   : > { %2158 = vmatpush1.bf16.msra.mxu1 %v3087_v4  ;;  %v671_v4 = vld [vmem:[%s4039_s3 + $0x100] sm:$0xff]  ;;  %4199 = vst [vmem:[#allocation46_spill] sm:$0xff] %v3149_v51  ;;  %4200 = vst [vmem:[#allocation47_spill] sm:$0xff] %v3151_v52  ;;  %v692_v52 = vld [vmem:[%s4039_s3 + $0x1a8] sm:$0xff]  ;;  %v3282_v51 = vsub.f32 %v679_v7, %v789_v57  ;;  %v827_v60 = vand.u32 4294901760, %v700_v45  ;;  %v831_v55 = vand.u32 4294901760, %v702_v56 }
  0x6e   : > { %464 = vrot.lane.b32.xlu1 %v2861_v16, %s2737_s12  ;;  %2160 = vmatprep.subr.bf16.mxu1 %v3098_v24  ;;  %v674_v24 = vld [vmem:[%s4039_s3 + $0x118] sm:$0xff]  ;;  %4201 = vst [vmem:[#allocation48_spill] sm:$0xff] %v3153_v53  ;;  %v773_v18 = vand.u32 4294901760, %v671_v4  ;;  %4204 = vst [vmem:[#allocation51_spill] sm:$0xff] %v3171_v26  ;;  %v3188_v29 = vpack.c.bf16 %v783_v39, %v779_v35  ;;  %v3226_v3 = vsub.f32 %v676_v19, %v779_v35  ;;  %v685_v53 = vld [vmem:[%s4039_s3 + $0x170] sm:$0xff] }
  0x6f   : > { %2354 = vmatpush1.bf16.msra.mxu0 %v3103_v25  ;;  %v775_v14 = vand.u32 4294901760, %v674_v24  ;;  %4224 = vst [vmem:[#allocation71_spill] sm:$0xff] %v3282_v51  ;;  %4239 = vst [vmem:[#allocation84_spill] sm:$0xff] %v3355_v33 }
  0x70   : > { %602 = vrot.lane.b32.xlu0 %v2861_v16, %s2743_s14  ;;  %2356 = vmatprep.subr.bf16.mxu0 %v3121_v49  ;;  %4208 = vst [vmem:[#allocation55_spill] sm:$0xff] %v3188_v29  ;;  %v3222_v26 = vsub.f32 %v671_v4, %v773_v18  ;;  %4214 = vst [vmem:[#allocation61_spill] sm:$0xff] %v3226_v3  ;;  %v3239_v4 = vsub.f32 %v675_v40, %v781_v31  ;;  %v688_v40 = vld [vmem:[%s4039_s3 + $0x188] sm:$0xff] }
  0x71   : > { %2162 = vmatpush1.bf16.msra.mxu1 %v3103_v25  ;;  %v3181_v44 = vpack.c.bf16 %v775_v14, %v771_v12 }
  0x72   : > { %615 = vperm.xlu1 %2630, %v2907_v30   ;;  %v3134_v30 = vsub.f32 %v664_v62, %v755_v8  ;;  %v673_v62 = vld [vmem:[%s4039_s3 + $0x110] sm:$0xff]  ;;  %v3161_v8 = vsub.f32 %v669_v43, %v769_v46  ;;  %2164 = vmatprep.subr.bf16.mxu1 %v3121_v49  ;;  %v3183_v46 = vsub.f32 %v674_v24, %v775_v14  ;;  %v682_v24 = vld [vmem:[%s4039_s3 + $0x158] sm:$0xff]  ;;  %v787_v14 = vand.u32 4294901760, %v680_v21 }
  0x73   : > { %2358 = vmatpush1.bf16.msra.mxu0 %v3125_v32  ;;  %v777_v34 = vand.u32 4294901760, %v673_v62  ;;  %v677_v43 = vld [vmem:[%s4039_s3 + $0x130] sm:$0xff]  ;;  %4205 = vst [vmem:[#allocation52_spill] sm:$0xff] %v3181_v44  ;;  %4212 = vst [vmem:[#allocation59_spill] sm:$0xff] %v3222_v26 }
  0x74   : > { %4196 = vst [vmem:[#allocation43_spill] sm:$0xff] %v3134_v30  ;;  %4203 = vst [vmem:[#allocation50_spill] sm:$0xff] %v3161_v8  ;;  %v785_v49 = vand.u32 4294901760, %v677_v43  ;;  %2360 = vmatprep.subr.bf16.mxu0 %v3181_v44  ;;  %v693_v30 = vld [vmem:[%s4039_s3 + $0x1b0] sm:$0xff] }
  0x75   : > { %4206 = vst [vmem:[#allocation53_spill] sm:$0xff] %v3183_v46  ;;  %2166 = vmatpush1.bf16.msra.mxu1 %v3125_v32  ;;  %v3186_v25 = vpack.c.bf16 %v777_v34, %v773_v18  ;;  %v791_v32 = vand.u32 4294901760, %v682_v24  ;;  %v686_v46 = vld [vmem:[%s4039_s3 + $0x178] sm:$0xff]  ;;  %v3224_v8 = vsub.f32 %v673_v62, %v777_v34  ;;  %4216 = vst [vmem:[#allocation63_spill] sm:$0xff] %v3239_v4 }
  0x76   : > { %501 = vrot.lane.b32.xlu1 %v2846_v10, %s2739_s7  ;;  %2168 = vmatprep.subr.bf16.mxu1 %v3181_v44  ;;  %v3199_v12 = vpack.c.bf16 %v785_v49, %v781_v31  ;;  %v681_v44 = vld [vmem:[%s4039_s3 + $0x150] sm:$0xff]  ;;  %v3241_v62 = vsub.f32 %v677_v43, %v785_v49  ;;  %v3243_v18 = vsub.f32 %v680_v21, %v787_v14  ;;  %v799_v34 = vand.u32 4294901760, %v686_v46  ;;  %v690_v21 = vld [vmem:[%s4039_s3 + $0x198] sm:$0xff]  ;;  %v687_v31 = vld [vmem:[%s4039_s3 + $0x180] sm:$0xff] }
  0x77   : > { %4207 = vst [vmem:[#allocation54_spill] sm:$0xff] %v3186_v25  ;;  %2362 = vmatpush1.bf16.msra.mxu0 %v3186_v25  ;;  %v793_v48 = vand.u32 4294901760, %v681_v44  ;;  %v3211_v47 = vpack.c.bf16 %v791_v32, %v787_v14  ;;  %4213 = vst [vmem:[#allocation60_spill] sm:$0xff] %v3224_v8  ;;  %v3245_v19 = vsub.f32 %v682_v24, %v791_v32  ;;  %v803_v49 = vand.u32 4294901760, %v688_v40  ;;  %v689_v24 = vld [vmem:[%s4039_s3 + $0x190] sm:$0xff] }
  0x78   : > { %4209 = vst [vmem:[#allocation56_spill] sm:$0xff] %v3199_v12  ;;  %2364 = vmatprep.subr.bf16.mxu0 %v3188_v29  ;;  %4217 = vst [vmem:[#allocation64_spill] sm:$0xff] %v3241_v62  ;;  %v807_v43 = vand.u32 4294901760, %v690_v21 }
  0x79   : > { %2170 = vmatpush1.bf16.msra.mxu1 %v3186_v25  ;;  %4210 = vst [vmem:[#allocation57_spill] sm:$0xff] %v3211_v47  ;;  %v3214_v38 = vpack.c.bf16 %v793_v48, %v789_v57  ;;  %v3228_v25 = vsub.f32 %v678_v20, %v783_v39  ;;  %4218 = vst [vmem:[#allocation65_spill] sm:$0xff] %v3243_v18  ;;  %v795_v20 = vand.u32 4294901760, %v684_v37  ;;  %v801_v39 = vand.u32 4294901760, %v685_v53 }
  0x7a   : > { %508 = vrot.lane.b32.xlu1 %v2850_v13, %s2739_s7  ;;  %2172 = vmatprep.subr.bf16.mxu1 %v3188_v29  ;;  %v683_v29 = vld [vmem:[%s4039_s3 + $0x160] sm:$0xff]  ;;  %4219 = vst [vmem:[#allocation66_spill] sm:$0xff] %v3245_v19  ;;  %v3271_v8 = vpack.c.bf16 %v807_v43, %v803_v49  ;;  %v3284_v50 = vsub.f32 %v681_v44, %v793_v48  ;;  %v811_v44 = vand.u32 4294901760, %v692_v52  ;;  %s2638_s7 = scalar_lea.vmem %s3991_s30, 128 }
  0x7b   : > { %4211 = vst [vmem:[#allocation58_spill] sm:$0xff] %v3214_v38  ;;  %4215 = vst [vmem:[#allocation62_spill] sm:$0xff] %v3228_v25  ;;  %2366 = vmatpush1.bf16.msra.mxu0 %v3199_v12  ;;  %v797_v35 = vand.u32 4294901760, %v683_v29  ;;  %v3257_v32 = vpack.c.bf16 %v799_v34, %v795_v20  ;;  %v3286_v41 = vsub.f32 %v684_v37, %v795_v20  ;;  %p2639_p12 = scmp.ne.s32.totalorder %s3991_s30, %s2638_s7 }
  0x7c   : > { %2368 = vmatprep.subr.bf16.mxu0 %v3211_v47  ;;  %4222 = vst [vmem:[#allocation69_spill] sm:$0xff] %v3271_v8  ;;  %4225 = vst [vmem:[#allocation72_spill] sm:$0xff] %v3284_v50  ;;  %v3301_v48 = vsub.f32 %v685_v53, %v801_v39  ;;  %v3303_v37 = vsub.f32 %v688_v40, %v803_v49  ;;  %v3305_v7 = vsub.f32 %v690_v21, %v807_v43  ;;  %v695_v40 = vld [vmem:[%s4039_s3 + $0x1c0] sm:$0xff]  ;;  %v697_v21 = vld [vmem:[%s4039_s3 + $0x1d0] sm:$0xff] }
  0x7d   : > { %2174 = vmatpush1.bf16.msra.mxu1 %v3199_v12  ;;  %4220 = vst [vmem:[#allocation67_spill] sm:$0xff] %v3257_v32  ;;  %v3267_v14 = vpack.c.bf16 %v801_v39, %v797_v35  ;;  %v809_v12 = vand.u32 4294901760, %v689_v24  ;;  %4226 = vst [vmem:[#allocation73_spill] sm:$0xff] %v3286_v41  ;;  %v3299_v57 = vsub.f32 %v683_v29, %v797_v35  ;;  %v698_v29 = vld [vmem:[%s4039_s3 + $0x1d8] sm:$0xff]  ;;  %v821_v43 = vand.u32 4294901760, %v695_v40  ;;  %p2640_p13 = pnand %p2639_p12, %p2811_p4 }
  0x7e   : > { %547 = vrot.lane.b32.xlu1 %v2846_v10, %s2741_s6  ;;  %2176 = vmatprep.subr.bf16.mxu1 %v3211_v47  ;;  %v805_v47 = vand.u32 4294901760, %v687_v31  ;;  %4229 = vst [vmem:[#allocation76_spill] sm:$0xff] %v3301_v48  ;;  %4230 = vst [vmem:[#allocation77_spill] sm:$0xff] %v3303_v37  ;;  %v823_v39 = vand.u32 4294901760, %v698_v29  ;;  %v3362_v9 = vsub.f32 %v692_v52, %v811_v44  ;;  %v1136_v59 = vand.u32 4294901760, %v3301_v48 }
  0x7f   : > { %2370 = vmatpush1.bf16.msra.mxu0 %v3214_v38  ;;  %4221 = vst [vmem:[#allocation68_spill] sm:$0xff] %v3267_v14  ;;  %4228 = vst [vmem:[#allocation75_spill] sm:$0xff] %v3299_v57  ;;  %v3360_v11 = vsub.f32 %v689_v24, %v809_v12  ;;  %v3381_v52 = vpack.c.bf16 %v831_v55, %v827_v60  ;;  %p2641_p0 = pneg %p2640_p13 }
  0x80   : > { %2372 = vmatprep.subr.bf16.mxu0 %v3257_v32  ;;  %v3274_v26 = vpack.c.bf16 %v809_v12, %v805_v47  ;;  %4231 = vst [vmem:[#allocation78_spill] sm:$0xff] %v3305_v7  ;;  %v3358_v17 = vsub.f32 %v687_v31, %v805_v47  ;;  %4242 = vst [vmem:[#allocation87_spill] sm:$0xff] %v3362_v9  ;;  %v3373_v36 = vsub.f32 %v698_v29, %v823_v39 }
  0x81   : > { %2178 = vmatpush1.bf16.msra.mxu1 %v3214_v38  ;;  %v3288_v38 = vsub.f32 %v686_v46, %v799_v34  ;;  %v817_v34 = vand.u32 4294901760, %v693_v30  ;;  %4241 = vst [vmem:[#allocation86_spill] sm:$0xff] %v3360_v11  ;;  %v3376_v47 = vsub.f32 %v695_v40, %v821_v43  ;;  %4250 = vst [vmem:[#allocation95_spill] sm:$0xff] %v3381_v52 }
  0x82   : > { %554 = vrot.lane.b32.xlu1 %v2850_v13, %s2741_s6  ;;  %2180 = vmatprep.subr.bf16.mxu1 %v3257_v32  ;;  %4223 = vst [vmem:[#allocation70_spill] sm:$0xff] %v3274_v26  ;;  %v691_v32 = vld [vmem:[%s4039_s3 + $0x1a0] sm:$0xff]  ;;  %4240 = vst [vmem:[#allocation85_spill] sm:$0xff] %v3358_v17  ;;  %v3383_v31 = vsub.f32 %v700_v45, %v827_v60  ;;  %s2644_s6 = scalar_lea.vmem %s2643_s11, 256 }
  0x83   : > { %4227 = vst [vmem:[#allocation74_spill] sm:$0xff] %v3288_v38  ;;  %2374 = vmatpush1.bf16.msra.mxu0 %v3267_v14  ;;  %v813_v20 = vand.u32 4294901760, %v691_v32  ;;  %v3369_v54 = vsub.f32 %v693_v30, %v817_v34  ;;  %4247 = vst [vmem:[#allocation92_spill] sm:$0xff] %v3373_v36  ;;  %p2646_p2 = scmp.lt.s32.totalorder %s2644_s6, %s2638_s7 }
  0x84   : > { %2376 = vmatprep.subr.bf16.mxu0 %v3271_v8  ;;  %4248 = vst [vmem:[#allocation93_spill] sm:$0xff] %v3376_v47  ;;  %4251 = vst [vmem:[#allocation96_spill] sm:$0xff] %v3383_v31 }
  0x85   : > { %2182 = vmatpush1.bf16.msra.mxu1 %v3267_v14  ;;  %v3325_v49 = vpack.c.bf16 %v817_v34, %v813_v20  ;;  %v3367_v27 = vsub.f32 %v691_v32, %v813_v20  ;;  %4245 = vst [vmem:[#allocation90_spill] sm:$0xff] %v3369_v54  ;;  %v3385_v32 = vsub.f32 %v702_v56, %v831_v55  ;;  %v866_v20 = vand.u32 4294901760, %v3355_v33  ;;  %p2647_p3 = por %p2646_p2, %p2645_p1 }
  0x86   : > { %593 = vrot.lane.b32.xlu1 %v2846_v10, %s2743_s14  ;;  %v694_v10 = vld [vmem:[%s4039_s3 + $0x1b8] sm:$0xff]  ;;  %2184 = vmatprep.subr.bf16.mxu1 %v3271_v8  ;;  %v825_v8 = vand.u32 4294901760, %v697_v21 }
  0x87   : > { %v815_v46 = vand.u32 4294901760, %v694_v10  ;;  %2378 = vmatpush1.bf16.msra.mxu0 %v3274_v26  ;;  %4233 = vst [vmem:[#allocation80_spill] sm:$0xff] %v3325_v49  ;;  %4244 = vst [vmem:[#allocation89_spill] sm:$0xff] %v3367_v27  ;;  %p2648_p5 = pnand %p2647_p3, %p2641_p0 }
  0x88   : > { %v3339_v61 = vpack.c.bf16 %v825_v8, %v821_v43  ;;  %v3378_v12 = vsub.f32 %v697_v21, %v825_v8  ;;  %4252 = vst [vmem:[#allocation97_spill] sm:$0xff] %v3385_v32  ;;  %v854_v8 = vand.u32 4294901760, %v3350_v42 }
  0x89   : > { %v3317_v53 = vpack.c.bf16 %v815_v46, %v811_v44  ;;  %2186 = vmatpush1.bf16.msra.mxu1 %v3274_v26  ;;  %v699_v26 = vld [vmem:[%s4039_s3 + $0x1e0] sm:$0xff]  ;;  %v3364_v6 = vsub.f32 %v694_v10, %v815_v46 }
  0x8a   : > { %600 = vrot.lane.b32.xlu1 %v2850_v13, %s2743_s14  ;;  %v696_v13 = vld [vmem:[%s4039_s3 + $0x1c8] sm:$0xff]  ;;  %4235 = vst [vmem:[#allocation82_spill] sm:$0xff] %v3339_v61  ;;  %v829_v23 = vand.u32 4294901760, %v699_v26  ;;  %4249 = vst [vmem:[#allocation94_spill] sm:$0xff] %v3378_v12  ;;  %v2391_v45 = vpack.c.bf16 %v866_v20, %v854_v8 }
  0x8b   : > { %4232 = vst [vmem:[#allocation79_spill] sm:$0xff] %v3317_v53  ;;  %v819_v35 = vand.u32 4294901760, %v696_v13  ;;  %2380 = vmatprep.subr.bf16.mxu0 %v3317_v53  ;;  %2188 = vmatprep.subr.bf16.mxu1 %v3317_v53  ;;  %v701_v53 = vld [vmem:[%s4039_s3 + $0x1f0] sm:$0xff]  ;;  %4243 = vst [vmem:[#allocation88_spill] sm:$0xff] %v3364_v6 }
  0x8c   : > { %2382 = vmatpush1.bf16.msra.mxu0 %v3325_v49  ;;  %v833_v22 = vand.u32 4294901760, %v701_v53  ;;  %v3389_v24 = vsub.f32 %v699_v26, %v829_v23 }
  0x8d   : > { %v3329_v14 = vpack.c.bf16 %v823_v39, %v819_v35  ;;  %2190 = vmatpush1.bf16.msra.mxu1 %v3325_v49  ;;  %v3371_v28 = vsub.f32 %v696_v13, %v819_v35  ;;  %v253_v35 = vlaneseq }
  0x8e   : > { %v3387_v30 = vpack.c.bf16 %v833_v22, %v829_v23  ;;  %4254 = vst [vmem:[#allocation99_spill] sm:$0xff] %v3389_v24  ;;  %v3391_v10 = vsub.f32 %v701_v53, %v833_v22  ;;  %v855_v23 = vsub.f32 %v3350_v42, %v854_v8  ;;  %v867_v22 = vsub.f32 %v3355_v33, %v866_v20 }
  0x8f   : > { %4234 = vst [vmem:[#allocation81_spill] sm:$0xff] %v3329_v14  ;;  %2384 = vmatprep.subr.bf16.mxu0 %v3329_v14  ;;  %4246 = vst [vmem:[#allocation91_spill] sm:$0xff] %v3371_v28  ;;  %2192 = vmatprep.subr.bf16.mxu1 %v3329_v14  ;;  %v3408_v40 = vand.u32 127, %v253_v35 }
  0x90   : > { %2386 = vmatpush1.bf16.msra.mxu0 %v3339_v61  ;;  %4253 = vst [vmem:[#allocation98_spill] sm:$0xff] %v3387_v30  ;;  %4255 = vst [vmem:[#allocation100_spill] sm:$0xff] %v3391_v10  ;;  %v856_v55 = vand.u32 4294901760, %v855_v23  ;;  %v868_v56 = vand.u32 4294901760, %v867_v22 }
  0x91   : > { %2388 = vmatprep.subr.bf16.mxu0 %v3381_v52  ;;  %2194 = vmatpush1.bf16.msra.mxu1 %v3339_v61  ;;  %vm255_vm0 = vcmp.lt.s32.totalorder %v3408_v40, 17  ;;  %vm303_vm1 = vcmp.lt.s32.totalorder %v3408_v40, 16  ;;  %vm349_vm2 = vcmp.lt.s32.totalorder %v3408_v40, 15  ;;  %vm395_vm3 = vcmp.lt.s32.totalorder %v3408_v40, 1 }
  0x92   : > { %2196 = vmatprep.subr.bf16.mxu1 %v3381_v52  ;;  %v2199_v34 = vpack.c.bf16 %v868_v56, %v856_v55  ;;  %vm459_vm4 = vcmp.lt.s32.totalorder %v3408_v40, 127  ;;  %vm505_vm5 = vcmp.lt.s32.totalorder %v3408_v40, 113  ;;  %vm551_vm6 = vcmp.lt.s32.totalorder %v3408_v40, 112 }
  0x93   : > { %vm597_vm7 = vcmp.lt.s32.totalorder %v3408_v40, 111 }
  0x94   : > { %2390 = vmatpush1.bf16.msra.mxu0 %v3387_v30 }
  0x95   : > { %2392 = vmatprep.subr.bf16.mxu0 %v2391_v45  ;;  %2198 = vmatpush1.bf16.msra.mxu1 %v3387_v30  ;;  %v286_v30 = vshrl.u32 %v253_v35, 7 }
  0x96   : > { %2200 = vmatprep.subr.bf16.mxu1 %v2199_v34 }
  0x97   : > { %v316_v44 = vpop.permute.xlu1 %315  ;;  %v271_v46 = vpop.permute.xlu0 %270  ;;  %v3414_v1 = vsub.s32 0, %v286_v30  ;;  %v3416_v0 = vsub.s32 1, %v286_v30 }
  0x9c   : > { %v322_v60 = vpop.permute.xlu1 %321  ;;  %v277_v26 = vpop.permute.xlu0 %276 }
  0xa1   : > { %v3402_v13 = vpop.permute.xlu1 %361  ;;  %v3404_v29 = vpop.permute.xlu0 %367 }
  0xa5   : > { %v250_v53 = vpop.permute.xlu0 %249 }
  0xa6   : > { %v3406_v39 = vpop.permute.xlu1 %407 }
  0xa9   : > { %v262_v21 = vpop.permute.xlu0 %261 }
  0xab   : > { %v3410_v43 = vpop.permute.xlu1 %413 }
  0xad   : > { %v300_v8 = vpop.permute.xlu0 %299 }
  0xaf   : > { %v252_v20 = vpop.permute.xlu1 %251 }
  0xb0   : > { %v256_v45 = vsel %vm255_vm0, %v250_v53, %v252_v20  ;;  %v257_v23 = vsel %vm255_vm0, %v252_v20, %v250_v53 }
  0xb1   : > { %v273_v22 = vmul.f32 %v271_v46, %v257_v23  ;;  %v274_v55 = vmul.f32 %v271_v46, %v256_v45  ;;  %v307_v56 = vpop.permute.xlu0 %306 }
  0xb3   : > { %v264_v34 = vpop.permute.xlu1 %263 }
  0xb4   : > { %v265_v52 = vsel %vm255_vm0, %v262_v21, %v264_v34  ;;  %v266_v61 = vsel %vm255_vm0, %v264_v34, %v262_v21 }
  0xb5   : > { %v279_v14 = vmul.f32 %v277_v26, %v266_v61  ;;  %v280_v49 = vmul.f32 %v277_v26, %v265_v52  ;;  %v346_v2 = vpop.permute.xlu0 %345  ;;  %v283_v61 = vld [vmem:[%s4038_s2] ss:$8 sm:$0x3] }
  0xb6   : > { %v288_v30 = vrot.slane %v283_v61, %v3414_v1  ;;  %v292_v35 = vrot.slane %v283_v61, %v3416_v0 }
  0xb7   : > { %v281_v33 = vadd.f32 %v279_v14, %v273_v22  ;;  %v282_v42 = vadd.f32 %v280_v49, %v274_v55  ;;  %v302_v5 = vpop.permute.xlu1 %301  ;;  %v2121_v14 = vld [vmem:[%s4038_s2 + $0x1] ss:$8 sm:$0x3] }
  0xb8   : > { %v304_v46 = vsel %vm303_vm1, %v300_v8, %v302_v5  ;;  %v305_v53 = vsel %vm303_vm1, %v302_v5, %v300_v8  ;;  %v334_v8 = vrot.slane %v2121_v14, %v3414_v1  ;;  %v338_v20 = vrot.slane %v2121_v14, %v3416_v0 }
  0xb9   : > { %v318_v52 = vmul.f32 %v316_v44, %v305_v53  ;;  %v319_v26 = vmul.f32 %v316_v44, %v304_v46  ;;  %v353_v23 = vpop.permute.xlu0 %352  ;;  %v2122_v46 = vld [vmem:[%s4038_s2 + $0x2] ss:$8 sm:$0x3]  ;;  %v295_v53 = vmul.f32 %v288_v30, %v281_v33  ;;  %v296_v61 = vmul.f32 %v292_v35, %v282_v42 }
  0xba   : > { %v384_v33 = vrot.slane %v2122_v46, %v3416_v0 }
  0xbb   : > { %v309_v49 = vpop.permute.xlu1 %308 }
  0xbc   : > { %v310_v21 = vsel %vm303_vm1, %v307_v56, %v309_v49  ;;  %v311_v5 = vsel %vm303_vm1, %v309_v49, %v307_v56 }
  0xbd   : > { %v324_v44 = vmul.f32 %v322_v60, %v311_v5  ;;  %v325_v45 = vmul.f32 %v322_v60, %v310_v21  ;;  %v380_v5 = vrot.slane %v2122_v46, %v3414_v1 }
  0xbf   : > { %v326_v22 = vadd.f32 %v324_v44, %v318_v52  ;;  %v327_v55 = vadd.f32 %v325_v45, %v319_v26  ;;  %v348_v34 = vpop.permute.xlu1 %347  ;;  %v1070_v52 = vand.u32 4294901760, %v3226_v3  ;;  %v1082_v26 = vand.u32 4294901760, %v3228_v25  ;;  %v3447_v45 = vpop.permute.xlu0 %438 }
  0xc0   : > { %v350_v49 = vsel %vm349_vm2, %v346_v2, %v348_v34  ;;  %v351_v60 = vsel %vm349_vm2, %v348_v34, %v346_v2 }
  0xc1   : > { %v341_v63 = vmul.f32 %v334_v8, %v326_v22  ;;  %v342_v56 = vmul.f32 %v338_v20, %v327_v55  ;;  %v3454_v2 = vpack.c.bf16 %v1082_v26, %v1070_v52  ;;  %v364_v35 = vmul.f32 %v3402_v13, %v351_v60 }
  0xc2   : > { %v1076_v22 = vand.u32 4294901760, %v3239_v4  ;;  %v1088_v55 = vand.u32 4294901760, %v3241_v62  ;;  %v1071_v34 = vsub.f32 %v3226_v3, %v1070_v52  ;;  %v1083_v46 = vsub.f32 %v3228_v25, %v1082_v26 }
  0xc3   : > { %v343_v14 = vadd.f32 %v341_v63, %v295_v53  ;;  %v344_v21 = vadd.f32 %v342_v56, %v296_v61  ;;  %v355_v44 = vpop.permute.xlu1 %354  ;;  %4256 = vst [vmem:[#allocation101_spill] sm:$0xff] %v3454_v2  ;;  %v365_v63 = vmul.f32 %v3402_v13, %v350_v49  ;;  %v3466_v56 = vpop.permute.xlu0 %477  ;;  %v3471_v13 = vld [vmem:[%s4038_s2 + $0x3] ss:$8 sm:$0x3]  ;;  %v1106_v26 = vand.u32 4294901760, %v3245_v19 }
  0xc4   : > { %v356_v42 = vsel %vm349_vm2, %v353_v23, %v355_v44  ;;  %v357_v30 = vsel %vm349_vm2, %v355_v44, %v353_v23  ;;  %v3474_v49 = vpack.c.bf16 %v1088_v55, %v1076_v22  ;;  %v1072_v60 = vand.u32 4294901760, %v1071_v34 }
  0xc5   : > { %v370_v8 = vmul.f32 %v3404_v29, %v357_v30  ;;  %v371_v20 = vmul.f32 %v3404_v29, %v356_v42  ;;  %v1094_v29 = vand.u32 4294901760, %v3243_v18  ;;  %v1084_v42 = vand.u32 4294901760, %v1083_v46 }
  0xc6   : > { %4257 = vst [vmem:[#allocation102_spill] sm:$0xff] %v3474_v49  ;;  %v1100_v30 = vand.u32 4294901760, %v3282_v51 }
  0xc7   : > { %v372_v53 = vadd.f32 %v370_v8, %v364_v35  ;;  %v373_v23 = vadd.f32 %v371_v20, %v365_v63  ;;  %v3464_v61 = vpop.permute.xlu1 %446  ;;  %v1077_v63 = vsub.f32 %v3239_v4, %v1076_v22  ;;  %v1089_v8 = vsub.f32 %v3241_v62, %v1088_v55  ;;  %v399_v49 = vpop.permute.xlu0 %398 }
  0xc8   : > { %v1112_v35 = vand.u32 4294901760, %v3284_v50  ;;  %v1095_v22 = vsub.f32 %v3243_v18, %v1094_v29  ;;  %v1130_v55 = vand.u32 4294901760, %v3288_v38 }
  0xc9   : > { %v387_v44 = vmul.f32 %v380_v5, %v372_v53  ;;  %v388_v52 = vmul.f32 %v384_v33, %v373_v23  ;;  %v3488_v5 = vpack.c.bf16 %v1084_v42, %v1072_v60  ;;  %v3490_v33 = vpack.c.bf16 %v1106_v26, %v1094_v29 }
  0xca   : > { %v1078_v53 = vand.u32 4294901760, %v1077_v63  ;;  %v1090_v23 = vand.u32 4294901760, %v1089_v8  ;;  %v1113_v42 = vsub.f32 %v3284_v50, %v1112_v35  ;;  %v1096_v63 = vand.u32 4294901760, %v1095_v22 }
  0xcb   : > { %v3484_v20 = vadd.f32 %v387_v44, %v343_v14  ;;  %v3486_v34 = vadd.f32 %v388_v52, %v344_v21  ;;  %4258 = vst [vmem:[#allocation103_spill] sm:$0xff] %v3488_v5  ;;  %4259 = vst [vmem:[#allocation104_spill] sm:$0xff] %v3490_v33  ;;  %v1107_v14 = vsub.f32 %v3245_v19, %v1106_v26  ;;  %v1118_v21 = vand.u32 4294901760, %v3286_v41 }
  0xcc   : > { %v3492_v46 = vpop.permute.xlu1 %471  ;;  %v3500_v60 = vpack.c.bf16 %v1090_v23, %v1078_v53  ;;  %v3502_v44 = vpack.c.bf16 %v1112_v35, %v1100_v30  ;;  %v1101_v52 = vsub.f32 %v3282_v51, %v1100_v30  ;;  %v1124_v29 = vand.u32 4294901760, %v3299_v57 }
  0xcd   : > { %v1108_v8 = vand.u32 4294901760, %v1107_v14  ;;  %v3506_v33 = vpack.c.bf16 %v1130_v55, %v1118_v21  ;;  %v1114_v2 = vand.u32 4294901760, %v1113_v42  ;;  %v1119_v53 = vsub.f32 %v3286_v41, %v1118_v21  ;;  %v3521_v42 = vpop.permute.xlu0 %517 }
  0xce   : > { %4260 = vst [vmem:[#allocation105_spill] sm:$0xff] %v3500_v60  ;;  %4261 = vst [vmem:[#allocation106_spill] sm:$0xff] %v3502_v44  ;;  %v1102_v26 = vand.u32 4294901760, %v1101_v52  ;;  %v1131_v44 = vsub.f32 %v3288_v38, %v1130_v55  ;;  %v1142_v30 = vand.u32 4294901760, %v3303_v37  ;;  %v1154_v35 = vand.u32 4294901760, %v3305_v7 }
  0xcf   : > { %4262 = vst [vmem:[#allocation107_spill] sm:$0xff] %v3506_v33  ;;  %v3511_v23 = vpack.c.bf16 %v1108_v8, %v1096_v63  ;;  %v3518_v14 = vpack.c.bf16 %v1136_v59, %v1124_v29  ;;  %v1120_v33 = vand.u32 4294901760, %v1119_v53  ;;  %v1125_v52 = vsub.f32 %v3299_v57, %v1124_v29 }
  0xd0   : > { %v392_v5 = vpop.permute.xlu1 %391  ;;  %v3516_v22 = vpack.c.bf16 %v1114_v2, %v1102_v26  ;;  %v1132_v60 = vand.u32 4294901760, %v1131_v44  ;;  %v3523_v58 = vpack.c.bf16 %v1154_v35, %v1142_v30  ;;  %v1137_v21 = vsub.f32 %v3301_v48, %v1136_v59 }
  0xd1   : > { %4263 = vst [vmem:[#allocation108_spill] sm:$0xff] %v3511_v23  ;;  %4265 = vst [vmem:[#allocation110_spill] sm:$0xff] %v3518_v14  ;;  %v1148_v55 = vand.u32 4294901760, %v3358_v17  ;;  %v1126_v8 = vand.u32 4294901760, %v1125_v52  ;;  %v1160_v23 = vand.u32 4294901760, %v3360_v11  ;;  %v1143_v2 = vsub.f32 %v3303_v37, %v1142_v30 }
  0xd2   : > { %4264 = vst [vmem:[#allocation109_spill] sm:$0xff] %v3516_v22  ;;  %4266 = vst [vmem:[#allocation111_spill] sm:$0xff] %v3523_v58  ;;  %v1155_v26 = vsub.f32 %v3305_v7, %v1154_v35  ;;  %v3534_v53 = vpack.c.bf16 %v1132_v60, %v1120_v33  ;;  %v1138_v58 = vand.u32 4294901760, %v1137_v21  ;;  %v1166_v35 = vand.u32 4294901760, %v3362_v9 }
  0xd3   : > { %v3538_v52 = vpack.c.bf16 %v1160_v23, %v1148_v55  ;;  %v1144_v22 = vand.u32 4294901760, %v1143_v2  ;;  %v1178_v7 = vand.u32 4294901760, %v3364_v6  ;;  %v1161_v33 = vsub.f32 %v3360_v11, %v1160_v23 }
  0xd4   : > { %v394_v63 = vpop.permute.xlu1 %393  ;;  %4267 = vst [vmem:[#allocation112_spill] sm:$0xff] %v3534_v53  ;;  %v3540_v48 = vpack.c.bf16 %v1138_v58, %v1126_v8  ;;  %v1156_v30 = vand.u32 4294901760, %v1155_v26  ;;  %v1172_v60 = vand.u32 4294901760, %v3367_v27  ;;  %v1184_v21 = vand.u32 4294901760, %v3369_v54 }
  0xd5   : > { %v396_v29 = vsel %vm395_vm3, %v392_v5, %v394_v63  ;;  %v397_v44 = vsel %vm395_vm3, %v394_v63, %v392_v5  ;;  %4268 = vst [vmem:[#allocation113_spill] sm:$0xff] %v3538_v52  ;;  %v1149_v5 = vsub.f32 %v3358_v17, %v1148_v55  ;;  %v3552_v63 = vpop.permute.xlu0 %569  ;;  %v3556_v2 = vpack.c.bf16 %v1178_v7, %v1166_v35 }
  0xd6   : > { %v410_v59 = vmul.f32 %v3406_v39, %v397_v44  ;;  %v411_v14 = vmul.f32 %v3406_v39, %v396_v29  ;;  %4269 = vst [vmem:[#allocation114_spill] sm:$0xff] %v3540_v48  ;;  %v3554_v8 = vpack.c.bf16 %v1156_v30, %v1144_v22  ;;  %v1162_v29 = vand.u32 4294901760, %v1161_v33 }
  0xd7   : > { %4271 = vst [vmem:[#allocation116_spill] sm:$0xff] %v3556_v2  ;;  %v1150_v26 = vand.u32 4294901760, %v1149_v5  ;;  %v3560_v44 = vpack.c.bf16 %v1184_v21, %v1172_v60  ;;  %v1167_v52 = vsub.f32 %v3362_v9, %v1166_v35  ;;  %v1179_v48 = vsub.f32 %v3364_v6, %v1178_v7 }
  0xd8   : > { %v401_v37 = vpop.permute.xlu1 %400  ;;  %4270 = vst [vmem:[#allocation115_spill] sm:$0xff] %v3554_v8  ;;  %v1173_v5 = vsub.f32 %v3367_v27, %v1172_v60  ;;  %v1185_v33 = vsub.f32 %v3369_v54, %v1184_v21  ;;  %v4274_v35 = vrot.slane %v3471_v13, %v3414_v1  ;;  %v1208_v60 = vand.u32 4294901760, %v3378_v12  ;;  %v4313_v27 = vld [vmem:[#allocation24_spill] sm:$0xff]  ;;  %v4314_v54 = vld [vmem:[#allocation26_spill] sm:$0xff] }
  0xd9   : > { %v402_v39 = vsel %vm395_vm3, %v399_v49, %v401_v37  ;;  %v403_v58 = vsel %vm395_vm3, %v401_v37, %v399_v49  ;;  %4272 = vst [vmem:[#allocation117_spill] sm:$0xff] %v3560_v44  ;;  %v1190_v37 = vand.u32 4294901760, %v3371_v28  ;;  %v3567_v30 = vpack.c.bf16 %v1162_v29, %v1150_v26 }
  0xda   : > { %v416_v55 = vmul.f32 %v3410_v43, %v403_v58  ;;  %v417_v23 = vmul.f32 %v3410_v43, %v402_v39  ;;  %v1202_v58 = vand.u32 4294901760, %v3373_v36  ;;  %v1168_v2 = vand.u32 4294901760, %v1167_v52 }
  0xdb   : > { %4273 = vst [vmem:[#allocation118_spill] sm:$0xff] %v3567_v30  ;;  %v1180_v43 = vand.u32 4294901760, %v1179_v48  ;;  %v1174_v48 = vand.u32 4294901760, %v1173_v5  ;;  %v1186_v52 = vand.u32 4294901760, %v1185_v33  ;;  %v1226_v5 = vand.u32 4294901760, %v3385_v32 }
  0xdc   : > { %v418_v49 = vadd.f32 %v416_v55, %v410_v59  ;;  %v419_v53 = vadd.f32 %v417_v23, %v411_v14  ;;  %v3565_v22 = vpop.permute.xlu1 %523  ;;  %v4275_v59 = vrot.slane %v3471_v13, %v3416_v0  ;;  %v3578_v39 = vpack.c.bf16 %v1202_v58, %v1190_v37  ;;  %v463_v23 = vpop.permute.xlu0 %462 }
  0xdd   : > { %v1196_v55 = vand.u32 4294901760, %v3376_v47  ;;  %v3581_v26 = vpack.c.bf16 %v1180_v43, %v1168_v2  ;;  %v1191_v13 = vsub.f32 %v3371_v28, %v1190_v37  ;;  %v1214_v43 = vand.u32 4294901760, %v3383_v31 }
  0xde   : > { %v433_v7 = vmul.f32 %v4274_v35, %v418_v49  ;;  %v434_v14 = vmul.f32 %v4275_v59, %v419_v53  ;;  %4276 = vst [vmem:[#allocation119_spill] sm:$0xff] %v3578_v39  ;;  %v1203_v53 = vsub.f32 %v3373_v36, %v1202_v58  ;;  %v3594_v35 = vpack.c.bf16 %v1186_v52, %v1174_v48 }
  0xdf   : > { %4277 = vst [vmem:[#allocation120_spill] sm:$0xff] %v3581_v26  ;;  %v3596_v2 = vpack.c.bf16 %v1208_v60, %v1196_v55  ;;  %v1192_v33 = vand.u32 4294901760, %v1191_v13  ;;  %v1197_v37 = vsub.f32 %v3376_v47, %v1196_v55  ;;  %v1209_v58 = vsub.f32 %v3378_v12, %v1208_v60 }
  0xe0   : > { %v3585_v21 = vadd.f32 %v433_v7, %v3484_v20  ;;  %v3588_v29 = vadd.f32 %v434_v14, %v3486_v34  ;;  %4278 = vst [vmem:[#allocation121_spill] sm:$0xff] %v3594_v35  ;;  %v1204_v20 = vand.u32 4294901760, %v1203_v53  ;;  %v3600_v7 = vpop.permute.xlu0 %609  ;;  %v3602_v34 = vpack.c.bf16 %v1226_v5, %v1214_v43 }
  0xe1   : > { %v3592_v49 = vpop.permute.xlu1 %563  ;;  %4279 = vst [vmem:[#allocation122_spill] sm:$0xff] %v3596_v2  ;;  %v1220_v59 = vand.u32 4294901760, %v3389_v24  ;;  %v1232_v48 = vand.u32 4294901760, %v3391_v10  ;;  %v1215_v52 = vsub.f32 %v3383_v31, %v1214_v43  ;;  %v1227_v2 = vsub.f32 %v3385_v32, %v1226_v5 }
  0xe2   : > { %4280 = vst [vmem:[#allocation123_spill] sm:$0xff] %v3602_v34  ;;  %v3607_v14 = vpack.c.bf16 %v1204_v20, %v1192_v33  ;;  %v1198_v53 = vand.u32 4294901760, %v1197_v37  ;;  %v1210_v35 = vand.u32 4294901760, %v1209_v58  ;;  %v442_v31 = vmul.f32 %v3447_v45, %v2855_v15 }
  0xe3   : > { %v1221_v39 = vsub.f32 %v3389_v24, %v1220_v59  ;;  %v3613_v34 = vpack.c.bf16 %v1232_v48, %v1220_v59  ;;  %v1216_v55 = vand.u32 4294901760, %v1215_v52  ;;  %v1228_v26 = vand.u32 4294901760, %v1227_v2  ;;  %v2636_v24 = vld [vmem:[%s2840_s13 + $0x18] sm:$0xff] }
  0xe4   : > { %4281 = vst [vmem:[#allocation124_spill] sm:$0xff] %v3607_v14  ;;  %v1233_v60 = vsub.f32 %v3391_v10, %v1232_v48  ;;  %v3616_v44 = vpack.c.bf16 %v1210_v35, %v1198_v53  ;;  %v504_v30 = vpop.permute.xlu0 %503  ;;  %v2124_v35 = vld [vmem:[%s4038_s2 + $0x5] ss:$8 sm:$0x3] }
  0xe5   : > { %v456_v13 = vpop.permute.xlu1 %455  ;;  %4282 = vst [vmem:[#allocation125_spill] sm:$0xff] %v3613_v34  ;;  %v1222_v33 = vand.u32 4294901760, %v1221_v39  ;;  %v3618_v20 = vpack.c.bf16 %v1228_v26, %v1216_v55  ;;  %v3631_v26 = vld [vmem:[%s4038_s2 + $0x6] ss:$8 sm:$0x3]  ;;  %v490_v53 = vrot.slane %v2124_v35, %v3414_v1  ;;  %v494_v55 = vrot.slane %v2124_v35, %v3416_v0 }
  0xe6   : > { %4283 = vst [vmem:[#allocation126_spill] sm:$0xff] %v3616_v44  ;;  %v1234_v14 = vand.u32 4294901760, %v1233_v60  ;;  %v3636_v48 = vld [vmem:[%s4038_s2 + $0x7] ss:$8 sm:$0x3] }
  0xe7   : > { %4284 = vst [vmem:[#allocation127_spill] sm:$0xff] %v3618_v20  ;;  %v3644_v60 = vld [vmem:[%s4038_s2 + $0x10] ss:$8 sm:$0x3] }
  0xe8   : > { %v3620_v5 = vpack.c.bf16 %v1234_v14, %v1222_v33  ;;  %v511_v58 = vpop.permute.xlu0 %510 }
  0xe9   : > { %v458_v43 = vpop.permute.xlu1 %457 }
  0xea   : > { %4285 = vst [vmem:[#allocation128_spill] sm:$0xff] %v3620_v5  ;;  %v460_v52 = vsel %vm459_vm4, %v456_v13, %v458_v43  ;;  %v450_v5 = vmul.f32 %v3464_v61, %v2861_v16 }
  0xec   : > { %v550_v34 = vpop.permute.xlu0 %549 }
  0xed   : > { %v465_v37 = vpop.permute.xlu1 %464 }
  0xee   : > { %v466_v39 = vsel %vm459_vm4, %v463_v23, %v465_v37  ;;  %v467_v2 = vsel %vm459_vm4, %v465_v37, %v463_v23  ;;  %v461_v23 = vsel %vm459_vm4, %v458_v43, %v456_v13  ;;  %v536_v37 = vrot.slane %v3631_v26, %v3414_v1 }
  0xef   : > { %v480_v33 = vmul.f32 %v3466_v56, %v466_v39  ;;  %v481_v35 = vmul.f32 %v3466_v56, %v467_v2  ;;  %v474_v43 = vmul.f32 %v3492_v46, %v460_v52  ;;  %v2635_v2 = vld [vmem:[%s2840_s13 + $0x10] sm:$0xff]  ;;  %v449_v13 = vmul.f32 %v2636_v24, %v3464_v61 }
  0xf0   : > { %v557_v20 = vpop.permute.xlu0 %556  ;;  %v441_v44 = vmul.f32 %v2635_v2, %v3447_v45  ;;  %v475_v52 = vmul.f32 %v3492_v46, %v461_v23  ;;  %v4308_v46 = vld [vmem:[#allocation23_spill] sm:$0xff] }
  0xf1   : > { %v3622_v8 = vpop.permute.xlu1 %615  ;;  %v482_v12 = vadd.f32 %v480_v33, %v474_v43  ;;  %v938_v28 = vand.u32 4294901760, %v4308_v46 }
  0xf2   : > { %v483_v47 = vadd.f32 %v481_v35, %v475_v52  ;;  %v451_v23 = vadd.f32 %v449_v13, %v441_v44 }
  0xf4   : > { %v596_v61 = vpop.permute.xlu0 %595 }
  0xf5   : > { %v502_v59 = vpop.permute.xlu1 %501 }
  0xf6   : > { %v506_v56 = vsel %vm505_vm5, %v502_v59, %v504_v30  ;;  %v507_v2 = vsel %vm505_vm5, %v504_v30, %v502_v59 }
  0xf7   : > { %v520_v30 = vmul.f32 %v3521_v42, %v506_v56  ;;  %v521_v33 = vmul.f32 %v3521_v42, %v507_v2  ;;  %v498_v56 = vmul.f32 %v494_v55, %v483_v47 }
  0xf9   : > { %v509_v14 = vpop.permute.xlu1 %508 }
  0xfa   : > { %v512_v39 = vsel %vm505_vm5, %v509_v14, %v511_v58  ;;  %v513_v32 = vsel %vm505_vm5, %v511_v58, %v509_v14 }
  0xfb   : > { %v526_v24 = vmul.f32 %v3565_v22, %v512_v39  ;;  %v527_v58 = vmul.f32 %v3565_v22, %v513_v32  ;;  %v452_v22 = vadd.f32 %v450_v5, %v442_v31  ;;  %v497_v39 = vmul.f32 %v490_v53, %v482_v12  ;;  %v4286_v5 = vld [vmem:[#allocation10_spill] sm:$0xff]  ;;  %v4289_v12 = vld [vmem:[#allocation13_spill] sm:$0xff] }
  0xfc   : > { %v860_v2 = vand.u32 4294901760, %v4286_v5  ;;  %v890_v47 = vand.u32 4294901760, %v4289_v12 }
  0xfd   : > { %v548_v10 = vpop.permute.xlu1 %547  ;;  %v529_v52 = vadd.f32 %v527_v58, %v521_v33 }
  0xfe   : > { %v552_v15 = vsel %vm551_vm6, %v548_v10, %v550_v34  ;;  %v553_v16 = vsel %vm551_vm6, %v550_v34, %v548_v10  ;;  %v528_v34 = vadd.f32 %v526_v24, %v520_v30 }
  0xff   : > { %v566_v43 = vmul.f32 %v3592_v49, %v552_v15  ;;  %v567_v44 = vmul.f32 %v3592_v49, %v553_v16  ;;  %v453_v15 = vadd.f32 %v451_v23, %v3585_v21  ;;  %v454_v49 = vadd.f32 %v452_v22, %v3588_v29  ;;  %v603_v16 = vpop.permute.xlu0 %602  ;;  %v4320_v22 = vld [vmem:[#allocation35_spill] sm:$0xff] }
 0x100   : > { %v543_v53 = vmul.f32 %v536_v37, %v528_v34  ;;  %v4290_v21 = vrot.slane %v3631_v26, %v3416_v0  ;;  %v4292_v37 = vrot.slane %v3636_v48, %v3414_v1 }
 0x101   : > { %v555_v45 = vpop.permute.xlu1 %554  ;;  %v500_v33 = vadd.f32 %v498_v56, %v454_v49 }
 0x102   : > { %v558_v59 = vsel %vm551_vm6, %v555_v45, %v557_v20  ;;  %v559_v32 = vsel %vm551_vm6, %v557_v20, %v555_v45  ;;  %v4288_v45 = vld [vmem:[#allocation12_spill] sm:$0xff]  ;;  %v544_v29 = vmul.f32 %v4290_v21, %v529_v52 }
 0x103   : > { %v572_v35 = vmul.f32 %v3552_v63, %v558_v59  ;;  %v573_v10 = vmul.f32 %v3552_v63, %v559_v32  ;;  %v4287_v63 = vld [vmem:[#allocation11_spill] sm:$0xff]  ;;  %v878_v30 = vand.u32 4294901760, %v4288_v45  ;;  %v499_v32 = vadd.f32 %v497_v39, %v453_v15 }
 0x104   : > { %v872_v24 = vand.u32 4294901760, %v4287_v63  ;;  %v546_v49 = vadd.f32 %v544_v29, %v500_v33  ;;  %v4298_v33 = vrot.slane %v3644_v60, %v3416_v0 }
 0x105   : > { %v594_v14 = vpop.permute.xlu1 %593  ;;  %v574_v42 = vadd.f32 %v572_v35, %v566_v43  ;;  %v575_v20 = vadd.f32 %v573_v10, %v567_v44  ;;  %v545_v52 = vadd.f32 %v543_v53, %v499_v32 }
 0x106   : > { %v598_v55 = vsel %vm597_vm7, %v594_v14, %v596_v61  ;;  %v599_v58 = vsel %vm597_vm7, %v596_v61, %v594_v14  ;;  %v4293_v61 = vrot.slane %v3636_v48, %v3416_v0  ;;  %v4319_v48 = vld [vmem:[#allocation34_spill] sm:$0xff] }
 0x107   : > { %v589_v10 = vmul.f32 %v4292_v37, %v574_v42  ;;  %v612_v26 = vmul.f32 %v3600_v7, %v598_v55  ;;  %v613_v44 = vmul.f32 %v3600_v7, %v599_v58  ;;  %v861_v42 = vsub.f32 %v4286_v5, %v860_v2  ;;  %v4296_v55 = vld [vmem:[#allocation14_spill] sm:$0xff] }
 0x108   : > { %v590_v14 = vmul.f32 %v4293_v61, %v575_v20  ;;  %v884_v7 = vand.u32 4294901760, %v4296_v55  ;;  %v879_v58 = vsub.f32 %v4288_v45, %v878_v30  ;;  %v974_v57 = vand.u32 4294901760, %v4319_v48 }
 0x109   : > { %v601_v23 = vpop.permute.xlu1 %600  ;;  %v591_v53 = vadd.f32 %v589_v10, %v545_v52  ;;  %v862_v20 = vand.u32 4294901760, %v861_v42  ;;  %v4302_v42 = vld [vmem:[#allocation19_spill] sm:$0xff] }
 0x10a   : > { %v604_v34 = vsel %vm597_vm7, %v601_v23, %v603_v16  ;;  %v605_v43 = vsel %vm597_vm7, %v603_v16, %v601_v23  ;;  %v873_v16 = vsub.f32 %v4287_v63, %v872_v24  ;;  %v592_v32 = vadd.f32 %v590_v14, %v546_v49  ;;  %v4301_v49 = vld [vmem:[#allocation17_spill] sm:$0xff] }
 0x10b   : > { %v618_v39 = vmul.f32 %v3622_v8, %v604_v34  ;;  %v619_v56 = vmul.f32 %v3622_v8, %v605_v43  ;;  %v891_v8 = vsub.f32 %v4289_v12, %v890_v47  ;;  %v4297_v23 = vrot.slane %v3644_v60, %v3414_v1  ;;  %v4300_v1 = vld [vmem:[#allocation16_spill] sm:$0xff] }
 0x10c   : > { %v2393_v34 = vpack.c.bf16 %v872_v24, %v860_v2  ;;  %v2395_v43 = vpack.c.bf16 %v890_v47, %v878_v30  ;;  %v874_v14 = vand.u32 4294901760, %v873_v16  ;;  %v902_v52 = vand.u32 4294901760, %v4300_v1 }
 0x10d   : > { %v620_v21 = vadd.f32 %v618_v39, %v612_v26  ;;  %v621_v37 = vadd.f32 %v619_v56, %v613_v44  ;;  %v4299_v26 = vld [vmem:[#allocation15_spill] sm:$0xff]  ;;  %v885_v0 = vsub.f32 %v4296_v55, %v884_v7  ;;  %v880_v24 = vand.u32 4294901760, %v879_v58 }
 0x10e   : > { %v896_v44 = vand.u32 4294901760, %v4299_v26  ;;  %v892_v30 = vand.u32 4294901760, %v891_v8  ;;  %v2201_v8 = vpack.c.bf16 %v874_v14, %v862_v20  ;;  %v975_v19 = vsub.f32 %v4319_v48, %v974_v57 }
 0x10f   : > { %v635_v61 = vmul.f32 %v4297_v23, %v620_v21  ;;  %v636_v29 = vmul.f32 %v4298_v33, %v621_v37  ;;  %v914_v21 = vand.u32 4294901760, %v4301_v49 }
 0x110   : > { %v2397_v47 = vpack.c.bf16 %v896_v44, %v884_v7  ;;  %v897_v37 = vsub.f32 %v4299_v26, %v896_v44  ;;  %v886_v7 = vand.u32 4294901760, %v885_v0  ;;  %v903_v44 = vsub.f32 %v4300_v1, %v902_v52 }
 0x111   : > { %v637_v56 = vadd.f32 %v635_v61, %v591_v53  ;;  %v638_v40 = vadd.f32 %v636_v29, %v592_v32  ;;  %v908_v53 = vand.u32 4294901760, %v4302_v42  ;;  %v4304_v61 = vld [vmem:[#allocation20_spill] sm:$0xff]  ;;  %v915_v39 = vsub.f32 %v4301_v49, %v914_v21 }
 0x112   : > { %v920_v33 = vand.u32 4294901760, %v4304_v61  ;;  %v2399_v59 = vpack.c.bf16 %v914_v21, %v902_v52  ;;  %v898_v31 = vand.u32 4294901760, %v897_v37  ;;  %v904_v10 = vand.u32 4294901760, %v903_v44  ;;  %v4317_v21 = vld [vmem:[#allocation31_spill] sm:$0xff] }
 0x113   : > { %v3758_v60 = vand.u32 4294901760, %v637_v56  ;;  %v3760_v2 = vand.u32 4294901760, %v638_v40  ;;  %v909_v29 = vsub.f32 %v4302_v42, %v908_v53 }
 0x114   : > { %v2401_v0 = vpack.c.bf16 %v920_v33, %v908_v53  ;;  %v921_v52 = vsub.f32 %v4304_v61, %v920_v33  ;;  %v4316_v33 = vld [vmem:[#allocation29_spill] sm:$0xff]  ;;  %v2205_v37 = vpack.c.bf16 %v898_v31, %v886_v7  ;;  %v4322_v7 = vld [vmem:[#allocation42_spill] sm:$0xff] }
 0x115   : > { %v3767_v32 = vsub.f32 %v638_v40, %v3760_v2  ;;  %v3770_v23 = vsub.f32 %v637_v56, %v3758_v60  ;;  %v2203_v40 = vpack.c.bf16 %v892_v30, %v880_v24  ;;  %v4307_v56 = vld [vmem:[#allocation21_spill] sm:$0xff]  ;;  %v916_v24 = vand.u32 4294901760, %v915_v39  ;;  %v4315_v39 = vld [vmem:[#allocation27_spill] sm:$0xff] }
 0x116   : > { %v926_v13 = vand.u32 4294901760, %v4307_v56  ;;  %v950_v44 = vand.u32 4294901760, %v4315_v39  ;;  %v962_v9 = vand.u32 4294901760, %v4316_v33  ;;  %v956_v30 = vand.u32 4294901760, %v4317_v21 }
 0x117   : > { %4303 = vst [vmem:[#allocation10_spill] sm:$0xff] %v3770_v23  ;;  %v837_v35 = vand.u32 4294901760, %v3767_v32  ;;  %v843_v16 = vand.u32 4294901760, %v3770_v23  ;;  %v2207_v6 = vpack.c.bf16 %v916_v24, %v904_v10  ;;  %v922_v11 = vand.u32 4294901760, %v921_v52 }
 0x118   : > { %v927_v53 = vsub.f32 %v4307_v56, %v926_v13  ;;  %v2403_v17 = vpack.c.bf16 %v938_v28, %v926_v13  ;;  %v957_v13 = vsub.f32 %v4317_v21, %v956_v30  ;;  %v992_v24 = vand.u32 4294901760, %v4322_v7 }
 0x119   : > { %1579 = vmatprep.mubr.f32.mxu0 %v837_v35  ;;  %v838_v20 = vsub.f32 %v3767_v32, %v837_v35  ;;  %v844_v14 = vsub.f32 %v3770_v23, %v843_v16  ;;  %v932_v35 = vand.u32 4294901760, %v4313_v27  ;;  %v944_v23 = vand.u32 4294901760, %v4314_v54 }
 0x11a   : > { %1583 = vmatmul.mubr.f32.vlgmr.msra.gmra.mrb[0].mxu0 %v843_v16  ;;  %v939_v16 = vsub.f32 %v4308_v46, %v938_v28  ;;  %v928_v31 = vand.u32 4294901760, %v927_v53  ;;  %v963_v28 = vsub.f32 %v4316_v33, %v962_v9  ;;  %v2744_v52 = vmov 18  }
 0x11b   : > { %2394 = vmatpush1.bf16.msra.mxu0 %v2393_v34  ;;  %1846 = vmatprep.mubr.f32.mxu0 %v3760_v2  ;;  %v839_v58 = vand.u32 4294901760, %v838_v20  ;;  %v845_v36 = vand.u32 4294901760, %v844_v14  ;;  %v910_v34 = vand.u32 4294901760, %v909_v29  ;;  %v4318_v20 = vld [vmem:[#allocation32_spill] sm:$0xff]  ;;  %v945_v15 = vsub.f32 %v4314_v54, %v944_v23 }
 0x11c   : > { %2396 = vmatprep.subr.bf16.mxu0 %v2395_v43  ;;  %v968_v14 = vand.u32 4294901760, %v4318_v20  ;;  %v933_v43 = vsub.f32 %v4313_v27, %v932_v35  ;;  %v940_v29 = vand.u32 4294901760, %v939_v16  ;;  %2631 = vset.pattern.permute.xlu1 %v2744_v52  ;;  %v2405_v38 = vpack.c.bf16 %v944_v23, %v932_v35  ;;  %v4324_v16 = vld [vmem:[#allocation44_spill] sm:$0xff] }
 0x11d   : > { %840 = vmatprep.mubr.f32.mxu1 %v839_v58  ;;  %v986_v58 = vand.u32 4294901760, %v4320_v22  ;;  %v2209_v41 = vpack.c.bf16 %v922_v11, %v910_v34  ;;  %v1010_v51 = vand.u32 4294901760, %v4324_v16  ;;  %2632 = vset.pattern.permute.xlu0 %v2744_v52  ;;  %v946_v18 = vand.u32 4294901760, %v945_v15 }
 0x11e   : > { %846 = vmatmul.mubr.f32.vlgmr.msra.gmra.mrb[0].mxu1 %v845_v36  ;;  %v951_v36 = vsub.f32 %v4315_v39, %v950_v44  ;;  %v969_v10 = vsub.f32 %v4318_v20, %v968_v14  ;;  %v934_v50 = vand.u32 4294901760, %v933_v43  ;;  %v2211_v11 = vpack.c.bf16 %v940_v29, %v928_v31  ;;  %v4326_v43 = vld [vmem:[#allocation46_spill] sm:$0xff] }
 0x11f   : > { %2202 = vmatpush1.bf16.msra.mxu1 %v2201_v8  ;;  %2398 = vmatpush1.bf16.msra.mxu0 %v2397_v47  ;;  %v4321_v47 = vld [vmem:[#allocation41_spill] sm:$0xff]  ;;  %v987_v4 = vsub.f32 %v4320_v22, %v986_v58  ;;  %v2407_v23 = vpack.c.bf16 %v962_v9, %v950_v44  ;;  %v964_v34 = vand.u32 4294901760, %v963_v28  ;;  %v958_v62 = vand.u32 4294901760, %v957_v13  ;;  %v4328_v13 = vld [vmem:[#allocation48_spill] sm:$0xff] }
 0x120   : > { %1237 = vmatprep.mubr.f32.mxu1 %v3760_v2  ;;  %2204 = vmatprep.subr.bf16.mxu1 %v2203_v40  ;;  %v980_v8 = vand.u32 4294901760, %v4321_v47  ;;  %v4323_v40 = vld [vmem:[#allocation43_spill] sm:$0xff]  ;;  %v952_v35 = vand.u32 4294901760, %v951_v36  ;;  %v970_v3 = vand.u32 4294901760, %v969_v10  ;;  %v993_v52 = vsub.f32 %v4322_v7, %v992_v24 }
 0x121   : > { %2400 = vmatprep.subr.bf16.mxu0 %v2399_v59  ;;  %v998_v53 = vand.u32 4294901760, %v4323_v40  ;;  %v2637_v59 = vld [vmem:[%s4037_s1] sm:$0xf]  ;;  %v1016_v15 = vand.u32 4294901760, %v4326_v43  ;;  %v1011_v22 = vsub.f32 %v4324_v16, %v1010_v51  ;;  %v2409_v9 = vpack.c.bf16 %v968_v14, %v956_v30  ;;  %v4332_v14 = vld [vmem:[#allocation53_spill] sm:$0xff] }
 0x122   : > { %704 = vperm.xlu1 %2631, %v2637_v59   ;;  %v981_v25 = vsub.f32 %v4321_v47, %v980_v8  ;;  %v988_v44 = vand.u32 4294901760, %v987_v4  ;;  %v2215_v31 = vpack.c.bf16 %v964_v34, %v952_v35  ;;  %v2411_v29 = vpack.c.bf16 %v986_v58, %v974_v57  ;;  %v4327_v36 = vld [vmem:[#allocation47_spill] sm:$0xff]  ;;  %v4330_v57 = vld [vmem:[#allocation50_spill] sm:$0xff] }
 0x123   : > { %2206 = vmatpush1.bf16.msra.mxu1 %v2205_v37  ;;  %2402 = vmatpush1.bf16.msra.mxu0 %v2401_v0  ;;  %v4325_v37 = vld [vmem:[#allocation45_spill] sm:$0xff]  ;;  %v999_v59 = vsub.f32 %v4323_v40, %v998_v53  ;;  %v1022_v28 = vand.u32 4294901760, %v4327_v36  ;;  %v1034_v10 = vand.u32 4294901760, %v4328_v13  ;;  %v2217_v7 = vpack.c.bf16 %v970_v3, %v958_v62  ;;  %v4331_v62 = vld [vmem:[#allocation51_spill] sm:$0xff] }
 0x124   : > { %2208 = vmatprep.subr.bf16.mxu1 %v2207_v6  ;;  %2404 = vmatprep.subr.bf16.mxu0 %v2403_v17  ;;  %v1004_v0 = vand.u32 4294901760, %v4325_v37  ;;  %v2213_v6 = vpack.c.bf16 %v946_v18, %v934_v50  ;;  %v976_v17 = vand.u32 4294901760, %v975_v19  ;;  %v2413_v47 = vpack.c.bf16 %v992_v24, %v980_v8  ;;  %v4329_v18 = vld [vmem:[#allocation49_spill] sm:$0xff] }
 0x125   : > { %v982_v48 = vand.u32 4294901760, %v981_v25  ;;  %v994_v40 = vand.u32 4294901760, %v993_v52  ;;  %v1000_v20 = vand.u32 4294901760, %v999_v59  ;;  %v1012_v16 = vand.u32 4294901760, %v1011_v22  ;;  %v4333_v52 = vld [vmem:[#allocation59_spill] sm:$0xff] }
 0x126   : > { %v2219_v50 = vpack.c.bf16 %v988_v44, %v976_v17  ;;  %v2415_v4 = vpack.c.bf16 %v1010_v51, %v998_v53  ;;  %v1028_v19 = vand.u32 4294901760, %v4329_v18  ;;  %v1040_v30 = vand.u32 4294901760, %v4330_v57 }
 0x127   : > { %2210 = vmatpush1.bf16.msra.mxu1 %v2209_v41  ;;  %2406 = vmatpush1.bf16.msra.mxu0 %v2405_v38  ;;  %v1005_v38 = vsub.f32 %v4325_v37, %v1004_v0  ;;  %v1017_v41 = vsub.f32 %v4326_v43, %v1016_v15  ;;  %v1023_v3 = vsub.f32 %v4327_v36, %v1022_v28  ;;  %v1046_v22 = vand.u32 4294901760, %v4331_v62 }
 0x128   : > { %2212 = vmatprep.subr.bf16.mxu1 %v2211_v11  ;;  %2408 = vmatprep.subr.bf16.mxu0 %v2407_v23  ;;  %v1035_v25 = vsub.f32 %v4328_v13, %v1034_v10  ;;  %v1058_v58 = vand.u32 4294901760, %v4332_v14  ;;  %v2221_v8 = vpack.c.bf16 %v994_v40, %v982_v48  ;;  %v2417_v24 = vpack.c.bf16 %v1016_v15, %v1004_v0 }
 0x129   : > { %v2223_v11 = vpack.c.bf16 %v1012_v16, %v1000_v20  ;;  %v2419_v23 = vpack.c.bf16 %v1034_v10, %v1022_v28  ;;  %v1006_v35 = vand.u32 4294901760, %v1005_v38  ;;  %v1018_v51 = vand.u32 4294901760, %v1017_v41 }
 0x12a   : > { %v1029_v53 = vsub.f32 %v4329_v18, %v1028_v19  ;;  %v1041_v34 = vsub.f32 %v4330_v57, %v1040_v30  ;;  %v1052_v59 = vand.u32 4294901760, %v4333_v52  ;;  %v1024_v17 = vand.u32 4294901760, %v1023_v3  ;;  %v4335_v3 = vld [vmem:[#allocation101_spill] sm:$0xff] }
 0x12b   : > { %2214 = vmatpush1.bf16.msra.mxu1 %v2213_v6  ;;  %2410 = vmatpush1.bf16.msra.mxu0 %v2409_v9  ;;  %v4334_v6 = vld [vmem:[#allocation60_spill] sm:$0xff]  ;;  %v1036_v44 = vand.u32 4294901760, %v1035_v25  ;;  %v1047_v48 = vsub.f32 %v4331_v62, %v1046_v22  ;;  %v1059_v20 = vsub.f32 %v4332_v14, %v1058_v58  ;;  %v2225_v40 = vpack.c.bf16 %v1018_v51, %v1006_v35  ;;  %v4336_v25 = vld [vmem:[#allocation102_spill] sm:$0xff]  ;;  %v4343_v35 = vld [vmem:[#allocation109_spill] sm:$0xff] }
 0x12c   : > { %2216 = vmatprep.subr.bf16.mxu1 %v2215_v31  ;;  %2412 = vmatprep.subr.bf16.mxu0 %v2411_v29  ;;  %v1064_v9 = vand.u32 4294901760, %v4334_v6  ;;  %v2421_v16 = vpack.c.bf16 %v1040_v30, %v1028_v19  ;;  %v1053_v0 = vsub.f32 %v4333_v52, %v1052_v59  ;;  %v2423_v29 = vpack.c.bf16 %v1058_v58, %v1046_v22  ;;  %v4337_v22 = vld [vmem:[#allocation103_spill] sm:$0xff]  ;;  %v4338_v58 = vld [vmem:[#allocation104_spill] sm:$0xff]  ;;  %v4344_v51 = vld [vmem:[#allocation110_spill] sm:$0xff] }
 0x12d   : > { %v2227_v31 = vpack.c.bf16 %v1036_v44, %v1024_v17  ;;  %v1048_v28 = vand.u32 4294901760, %v1047_v48  ;;  %v1060_v10 = vand.u32 4294901760, %v1059_v20  ;;  %v4349_v17 = vld [vmem:[#allocation115_spill] sm:$0xff]  ;;  %v4350_v44 = vld [vmem:[#allocation116_spill] sm:$0xff]  ;;  %v4351_v48 = vld [vmem:[#allocation118_spill] sm:$0xff] }
 0x12e   : > { %v1065_v15 = vsub.f32 %v4334_v6, %v1064_v9  ;;  %v2425_v41 = vpack.c.bf16 %v1064_v9, %v1052_v59  ;;  %v4347_v59 = vld [vmem:[#allocation114_spill] sm:$0xff]  ;;  %v4348_v9 = vld [vmem:[#allocation113_spill] sm:$0xff] }
 0x12f   : > { %2218 = vmatpush1.bf16.msra.mxu1 %v2217_v7  ;;  %2414 = vmatpush1.bf16.msra.mxu0 %v2413_v47  ;;  %v1030_v47 = vand.u32 4294901760, %v1029_v53  ;;  %v1042_v7 = vand.u32 4294901760, %v1041_v34  ;;  %v2231_v19 = vpack.c.bf16 %v1060_v10, %v1048_v28  ;;  %v4345_v53 = vld [vmem:[#allocation112_spill] sm:$0xff]  ;;  %v4346_v34 = vld [vmem:[#allocation111_spill] sm:$0xff]  ;;  %v4352_v20 = vld [vmem:[#allocation117_spill] sm:$0xff] }
 0x130   : > { %2220 = vmatprep.subr.bf16.mxu1 %v2219_v50  ;;  %2416 = vmatprep.subr.bf16.mxu0 %v2415_v4  ;;  %v1054_v50 = vand.u32 4294901760, %v1053_v0  ;;  %v1066_v4 = vand.u32 4294901760, %v1065_v15  ;;  %v4357_v0 = vld [vmem:[#allocation124_spill] sm:$0xff]  ;;  %v4358_v15 = vld [vmem:[#allocation123_spill] sm:$0xff]  ;;  %v4362_v10 = vld [vmem:[#allocation5_spill] sm:$0xff] }
 0x131   : > { %v2229_v38 = vpack.c.bf16 %v1042_v7, %v1030_v47  ;;  %v4355_v47 = vld [vmem:[#allocation121_spill] sm:$0xff]  ;;  %v4356_v7 = vld [vmem:[#allocation122_spill] sm:$0xff]  ;;  %v4361_v28 = vld [vmem:[#allocation127_spill] sm:$0xff] }
 0x132   : > { %v2233_v30 = vpack.c.bf16 %v1066_v4, %v1054_v50  ;;  %v4365_v4 = vld [vmem:[#allocation128_spill] sm:$0xff] }
 0x133   : > { %2222 = vmatpush1.bf16.msra.mxu1 %v2221_v8  ;;  %2418 = vmatpush1.bf16.msra.mxu0 %v2417_v24  ;;  %v4339_v8 = vld [vmem:[#allocation105_spill] sm:$0xff]  ;;  %v4340_v24 = vld [vmem:[#allocation106_spill] sm:$0xff] }
 0x134   : > { %2224 = vmatprep.subr.bf16.mxu1 %v2223_v11  ;;  %2420 = vmatprep.subr.bf16.mxu0 %v2419_v23  ;;  %v4341_v11 = vld [vmem:[#allocation108_spill] sm:$0xff]  ;;  %v4342_v23 = vld [vmem:[#allocation107_spill] sm:$0xff] }
 0x137   : > { %2226 = vmatpush1.bf16.msra.mxu1 %v2225_v40  ;;  %2422 = vmatpush1.bf16.msra.mxu0 %v2421_v16  ;;  %v4353_v40 = vld [vmem:[#allocation120_spill] sm:$0xff]  ;;  %v4354_v16 = vld [vmem:[#allocation119_spill] sm:$0xff] }
 0x138   : > { %2228 = vmatprep.subr.bf16.mxu1 %v2227_v31  ;;  %2424 = vmatprep.subr.bf16.mxu0 %v2423_v29  ;;  %v4359_v31 = vld [vmem:[#allocation126_spill] sm:$0xff]  ;;  %v4360_v29 = vld [vmem:[#allocation125_spill] sm:$0xff] }
 0x13b   : > { %2230 = vmatpush1.bf16.msra.mxu1 %v2229_v38  ;;  %2426 = vmatpush1.bf16.msra.mxu0 %v2425_v41  ;;  %v4363_v38 = vld [vmem:[#allocation83_spill] sm:$0xff]  ;;  %v4364_v41 = vld [vmem:[#allocation84_spill] sm:$0xff] }
 0x13c   : > { %2232 = vmatprep.subr.bf16.mxu1 %v2231_v19  ;;  %2428 = vmatprep.subr.bf16.mxu0 %v4335_v3  ;;  %v2263_v50 = vpack.c.bf16 %v4364_v41, %v4363_v38  ;;  %v4366_v19 = vld [vmem:[#allocation6_spill] sm:$0xff]  ;;  %v2267_v3 = vpack.c.bf16 %v4289_v12, %v4288_v45  ;;  %v2273_v45 = vpack.c.bf16 %v4304_v61, %v4302_v42  ;;  %v4374_v42 = vld [vmem:[#allocation32_spill] sm:$0xff]  ;;  %v4409_v41 = vld [vmem:[#allocation73_spill] sm:$0xff] }
 0x13d   : > { %v4370_v12 = vld [vmem:[#allocation18_spill] sm:$0xff]  ;;  %v2281_v61 = vpack.c.bf16 %v4374_v42, %v4317_v21  ;;  %v2289_v21 = vpack.c.bf16 %v4326_v43, %v4325_v37  ;;  %v2297_v37 = vpack.c.bf16 %v4334_v6, %v4333_v52  ;;  %v4401_v6 = vld [vmem:[#allocation65_spill] sm:$0xff] }
 0x13e   : > { %v4389_v43 = vld [vmem:[#allocation54_spill] sm:$0xff] }
 0x13f   : > { %2234 = vmatpush1.bf16.msra.mxu1 %v2233_v30  ;;  %2430 = vmatpush1.bf16.msra.mxu0 %v4336_v25  ;;  %v2265_v30 = vpack.c.bf16 %v4287_v63, %v4286_v5  ;;  %v4367_v25 = vld [vmem:[#allocation7_spill] sm:$0xff]  ;;  %v2271_v5 = vpack.c.bf16 %v4301_v49, %v4300_v1  ;;  %v4369_v63 = vld [vmem:[#allocation9_spill] sm:$0xff]  ;;  %v2279_v1 = vpack.c.bf16 %v4316_v33, %v4315_v39  ;;  %v4373_v49 = vld [vmem:[#allocation28_spill] sm:$0xff] }
 0x140   : > { %2236 = vmatprep.subr.bf16.mxu1 %v4337_v22  ;;  %2432 = vmatprep.subr.bf16.mxu0 %v4338_v58  ;;  %v2269_v22 = vpack.c.bf16 %v4299_v26, %v4296_v55  ;;  %v4368_v58 = vld [vmem:[#allocation8_spill] sm:$0xff]  ;;  %v2277_v55 = vpack.c.bf16 %v4314_v54, %v4313_v27  ;;  %v4372_v26 = vld [vmem:[#allocation25_spill] sm:$0xff]  ;;  %v4380_v54 = vld [vmem:[#allocation42_spill] sm:$0xff] }
 0x141   : > { %v4379_v27 = vld [vmem:[#allocation41_spill] sm:$0xff]  ;;  %v4382_v39 = vld [vmem:[#allocation43_spill] sm:$0xff]  ;;  %v4383_v33 = vld [vmem:[#allocation44_spill] sm:$0xff] }
 0x142   : > { %v4400_v52 = vld [vmem:[#allocation66_spill] sm:$0xff] }
 0x143   : > { %2238 = vmatpush1.bf16.msra.mxu1 %v4339_v8  ;;  %2434 = vmatpush1.bf16.msra.mxu0 %v4340_v24  ;;  %v4375_v8 = vld [vmem:[#allocation30_spill] sm:$0xff] }
 0x144   : > { %2240 = vmatprep.subr.bf16.mxu1 %v4341_v11  ;;  %2436 = vmatprep.subr.bf16.mxu0 %v4342_v23  ;;  %v4378_v11 = vld [vmem:[#allocation33_spill] sm:$0xff]  ;;  %v2285_v23 = vpack.c.bf16 %v4380_v54, %v4379_v27  ;;  %v4408_v38 = vld [vmem:[#allocation74_spill] sm:$0xff]  ;;  %v4435_v27 = vld [vmem:[#allocation95_spill] sm:$0xff] }
 0x145   : > { %v4428_v42 = vld [vmem:[#allocation90_spill] sm:$0xff] }
 0x146   : > { %v4436_v54 = vld [vmem:[#allocation94_spill] sm:$0xff] }
 0x147   : > { %2242 = vmatpush1.bf16.msra.mxu1 %v4343_v35  ;;  %2438 = vmatpush1.bf16.msra.mxu0 %v4344_v51  ;;  %v4381_v35 = vld [vmem:[#allocation36_spill] sm:$0xff]  ;;  %v2287_v51 = vpack.c.bf16 %v4383_v33, %v4382_v39  ;;  %v4439_v39 = vld [vmem:[#allocation98_spill] sm:$0xff]  ;;  %v4440_v33 = vld [vmem:[#allocation97_spill] sm:$0xff] }
 0x148   : > { %2244 = vmatprep.subr.bf16.mxu1 %v4345_v53  ;;  %2440 = vmatprep.subr.bf16.mxu0 %v4346_v34  ;;  %v4384_v53 = vld [vmem:[#allocation37_spill] sm:$0xff]  ;;  %v4385_v34 = vld [vmem:[#allocation38_spill] sm:$0xff] }
 0x14b   : > { %2246 = vmatpush1.bf16.msra.mxu1 %v4347_v59  ;;  %2442 = vmatpush1.bf16.msra.mxu0 %v4348_v9  ;;  %v2291_v59 = vpack.c.bf16 %v4328_v13, %v4327_v36  ;;  %v4386_v9 = vld [vmem:[#allocation39_spill] sm:$0xff]  ;;  %v4391_v13 = vld [vmem:[#allocation56_spill] sm:$0xff] }
 0x14c   : > { %2248 = vmatprep.subr.bf16.mxu1 %v4349_v17  ;;  %2444 = vmatprep.subr.bf16.mxu0 %v4350_v44  ;;  %v2293_v17 = vpack.c.bf16 %v4330_v57, %v4329_v18  ;;  %v4387_v44 = vld [vmem:[#allocation40_spill] sm:$0xff]  ;;  %v4390_v36 = vld [vmem:[#allocation55_spill] sm:$0xff]  ;;  %v4392_v18 = vld [vmem:[#allocation62_spill] sm:$0xff] }
 0x14d   : > { %v4393_v57 = vld [vmem:[#allocation61_spill] sm:$0xff] }
 0x14f   : > { %2250 = vmatpush1.bf16.msra.mxu1 %v4351_v48  ;;  %2446 = vmatpush1.bf16.msra.mxu0 %v4352_v20  ;;  %v2295_v48 = vpack.c.bf16 %v4332_v14, %v4331_v62  ;;  %v4388_v20 = vld [vmem:[#allocation52_spill] sm:$0xff]  ;;  %v4397_v14 = vld [vmem:[#allocation63_spill] sm:$0xff] }
 0x150   : > { %2252 = vmatprep.subr.bf16.mxu1 %v4353_v40  ;;  %2448 = vmatprep.subr.bf16.mxu0 %v4354_v16  ;;  %v4394_v40 = vpack.c.bf16 %v4392_v18, %v4393_v57  ;;  %v4395_v16 = vld [vmem:[#allocation57_spill] sm:$0xff]  ;;  %v4396_v62 = vld [vmem:[#allocation64_spill] sm:$0xff] }
 0x153   : > { %2254 = vmatpush1.bf16.msra.mxu1 %v4355_v47  ;;  %2450 = vmatpush1.bf16.msra.mxu0 %v4356_v7  ;;  %v4398_v47 = vpack.c.bf16 %v4396_v62, %v4397_v14  ;;  %v4399_v7 = vld [vmem:[#allocation58_spill] sm:$0xff] }
 0x154   : > { %2256 = vmatprep.subr.bf16.mxu1 %v4357_v0  ;;  %2452 = vmatprep.subr.bf16.mxu0 %v4358_v15  ;;  %v4402_v0 = vpack.c.bf16 %v4400_v52, %v4401_v6  ;;  %v4403_v15 = vld [vmem:[#allocation67_spill] sm:$0xff] }
 0x157   : > { %2258 = vmatpush1.bf16.msra.mxu1 %v4359_v31  ;;  %2454 = vmatpush1.bf16.msra.mxu0 %v4360_v29  ;;  %v4404_v31 = vld [vmem:[#allocation72_spill] sm:$0xff]  ;;  %v4405_v29 = vld [vmem:[#allocation71_spill] sm:$0xff] }
 0x158   : > { %2260 = vmatprep.subr.bf16.mxu1 %v4361_v28  ;;  %2456 = vmatprep.subr.bf16.mxu0 %v4362_v10  ;;  %v4406_v28 = vpack.c.bf16 %v4404_v31, %v4405_v29  ;;  %v4407_v10 = vld [vmem:[#allocation68_spill] sm:$0xff] }
 0x15a   : > { %1848 = vmatmul.mubr.f32.vlgmr.msra.gmra.mrb[0].mxu0 %v3758_v60 }
 0x15b   : > { %2262 = vmatpush1.bf16.msra.mxu1 %v4365_v4  ;;  %2458 = vmatpush1.bf16.msra.mxu0 %v4366_v19  ;;  %v4411_v4 = vld [vmem:[#allocation69_spill] sm:$0xff]  ;;  %v4412_v19 = vld [vmem:[#allocation76_spill] sm:$0xff] }
 0x15c   : > { %1983 = vmatprep.mubr.f32.mxu0 %v3760_v2  ;;  %2264 = vmatprep.subr.bf16.mxu1 %v2263_v50  ;;  %v2275_v2 = vpack.c.bf16 %v4308_v46, %v4307_v56  ;;  %v4376_v46 = vld [vmem:[#allocation34_spill] sm:$0xff]  ;;  %v4377_v56 = vld [vmem:[#allocation35_spill] sm:$0xff]  ;;  %v4410_v50 = vpack.c.bf16 %v4408_v38, %v4409_v41 }
 0x15d   : > { %2460 = vmatprep.subr.bf16.mxu0 %v4367_v25  ;;  %v2283_v24 = vpack.c.bf16 %v4377_v56, %v4376_v46  ;;  %v4415_v25 = vld [vmem:[#allocation70_spill] sm:$0xff]  ;;  %v4432_v56 = vld [vmem:[#allocation92_spill] sm:$0xff] }
 0x15e   : > { %1239 = vmatmul.mubr.f32.vlgmr.msra.gmra.mrb[0].mxu1 %v3758_v60  ;;  %v4431_v46 = vld [vmem:[#allocation82_spill] sm:$0xff] }
 0x15f   : > { %2266 = vmatpush1.bf16.msra.mxu1 %v2265_v30  ;;  %1439 = vmatprep.mubr.f32.mxu1 %v3767_v32  ;;  %v4371_v32 = vld [vmem:[#allocation22_spill] sm:$0xff]  ;;  %v4413_v30 = vld [vmem:[#allocation75_spill] sm:$0xff] }
 0x160   : > { %2462 = vmatpush1.bf16.msra.mxu0 %v4368_v58  ;;  %2268 = vmatprep.subr.bf16.mxu1 %v2267_v3  ;;  %v4414_v3 = vpack.c.bf16 %v4412_v19, %v4413_v30  ;;  %v4417_v58 = vld [vmem:[#allocation77_spill] sm:$0xff] }
 0x161   : > { %2464 = vmatprep.subr.bf16.mxu0 %v4369_v63  ;;  %v4419_v63 = vld [vmem:[#allocation79_spill] sm:$0xff] }
 0x163   : > { %2270 = vmatpush1.bf16.msra.mxu1 %v2269_v22  ;;  %v4416_v22 = vld [vmem:[#allocation78_spill] sm:$0xff] }
 0x164   : > { %2466 = vmatpush1.bf16.msra.mxu0 %v4370_v12  ;;  %2272 = vmatprep.subr.bf16.mxu1 %v2271_v5  ;;  %v4418_v5 = vpack.c.bf16 %v4416_v22, %v4417_v58  ;;  %v4421_v12 = vld [vmem:[#allocation85_spill] sm:$0xff] }
 0x165   : > { %2468 = vmatprep.subr.bf16.mxu0 %v4371_v32  ;;  %v4423_v32 = vld [vmem:[#allocation80_spill] sm:$0xff] }
 0x167   : > { %2274 = vmatpush1.bf16.msra.mxu1 %v2273_v45  ;;  %v4420_v45 = vld [vmem:[#allocation86_spill] sm:$0xff] }
 0x168   : > { %2470 = vmatpush1.bf16.msra.mxu0 %v4372_v26  ;;  %2276 = vmatprep.subr.bf16.mxu1 %v2275_v2  ;;  %v4422_v2 = vpack.c.bf16 %v4420_v45, %v4421_v12  ;;  %v4425_v26 = vld [vmem:[#allocation87_spill] sm:$0xff] }
 0x169   : > { %2472 = vmatprep.subr.bf16.mxu0 %v4373_v49  ;;  %v4427_v49 = vld [vmem:[#allocation81_spill] sm:$0xff] }
 0x16b   : > { %2278 = vmatpush1.bf16.msra.mxu1 %v2277_v55  ;;  %v4424_v55 = vld [vmem:[#allocation88_spill] sm:$0xff] }
 0x16c   : > { %2474 = vmatpush1.bf16.msra.mxu0 %v4375_v8  ;;  %2280 = vmatprep.subr.bf16.mxu1 %v2279_v1  ;;  %v4426_v1 = vpack.c.bf16 %v4424_v55, %v4425_v26 }
 0x16d   : > { %2476 = vmatprep.subr.bf16.mxu0 %v4378_v11 }
 0x16f   : > { %2282 = vmatpush1.bf16.msra.mxu1 %v2281_v61  ;;  %v4429_v61 = vld [vmem:[#allocation89_spill] sm:$0xff] }
 0x170   : > { %2478 = vmatpush1.bf16.msra.mxu0 %v4381_v35  ;;  %2284 = vmatprep.subr.bf16.mxu1 %v2283_v24  ;;  %v4430_v8 = vpack.c.bf16 %v4428_v42, %v4429_v61  ;;  %v4433_v24 = vld [vmem:[#allocation91_spill] sm:$0xff] }
 0x171   : > { %2480 = vmatprep.subr.bf16.mxu0 %v4384_v53  ;;  %v4434_v11 = vpack.c.bf16 %v4432_v56, %v4433_v24 }
 0x173   : > { %2286 = vmatpush1.bf16.msra.mxu1 %v2285_v23  ;;  %v4437_v23 = vld [vmem:[#allocation93_spill] sm:$0xff] }
 0x174   : > { %2482 = vmatpush1.bf16.msra.mxu0 %v4385_v34  ;;  %2288 = vmatprep.subr.bf16.mxu1 %v2287_v51  ;;  %v4438_v35 = vpack.c.bf16 %v4436_v54, %v4437_v23  ;;  %v4441_v51 = vld [vmem:[#allocation96_spill] sm:$0xff]  ;;  %v4444_v34 = vld [vmem:[#allocation99_spill] sm:$0xff] }
 0x175   : > { %2484 = vmatprep.subr.bf16.mxu0 %v4386_v9  ;;  %v4442_v53 = vpack.c.bf16 %v4440_v33, %v4441_v51  ;;  %v4446_v9 = vld [vmem:[#allocation10_spill] sm:$0xff] }
 0x177   : > { %2290 = vmatpush1.bf16.msra.mxu1 %v2289_v21  ;;  %v4443_v21 = vld [vmem:[#allocation100_spill] sm:$0xff] }
 0x178   : > { %2486 = vmatpush1.bf16.msra.mxu0 %v4387_v44  ;;  %2292 = vmatprep.subr.bf16.mxu1 %v2291_v59  ;;  %v4445_v59 = vpack.c.bf16 %v4443_v21, %v4444_v34 }
 0x179   : > { %2488 = vmatprep.subr.bf16.mxu0 %v4388_v20 }
 0x17b   : > { %2294 = vmatpush1.bf16.msra.mxu1 %v2293_v17 }
 0x17c   : > { %2490 = vmatpush1.bf16.msra.mxu0 %v4389_v43  ;;  %2296 = vmatprep.subr.bf16.mxu1 %v2295_v48 }
 0x17d   : > { %2492 = vmatprep.subr.bf16.mxu0 %v4390_v36 }
 0x17f   : > { %2298 = vmatpush1.bf16.msra.mxu1 %v2297_v37 }
 0x180   : > { %2494 = vmatpush1.bf16.msra.mxu0 %v4391_v13  ;;  %2300 = vmatprep.subr.bf16.mxu1 %v4394_v40 }
 0x181   : > { %2496 = vmatprep.subr.bf16.mxu0 %v4395_v16 }
 0x183   : > { %2302 = vmatpush1.bf16.msra.mxu1 %v4398_v47 }
 0x184   : > { %2498 = vmatpush1.bf16.msra.mxu0 %v4399_v7  ;;  %2304 = vmatprep.subr.bf16.mxu1 %v4402_v0 }
 0x185   : > { %2500 = vmatprep.subr.bf16.mxu0 %v4403_v15 }
 0x187   : > { %2306 = vmatpush1.bf16.msra.mxu1 %v4406_v28 }
 0x188   : > { %2502 = vmatpush1.bf16.msra.mxu0 %v4407_v10  ;;  %2308 = vmatprep.subr.bf16.mxu1 %v4410_v50 }
 0x189   : > { %2504 = vmatprep.subr.bf16.mxu0 %v4411_v4 }
 0x18b   : > { %2310 = vmatpush1.bf16.msra.mxu1 %v4414_v3 }
 0x18c   : > { %2506 = vmatpush1.bf16.msra.mxu0 %v4415_v25  ;;  %2312 = vmatprep.subr.bf16.mxu1 %v4418_v5 }
 0x18d   : > { %2508 = vmatprep.subr.bf16.mxu0 %v4419_v63 }
 0x18f   : > { %2314 = vmatpush1.bf16.msra.mxu1 %v4422_v2 }
 0x190   : > { %2510 = vmatpush1.bf16.msra.mxu0 %v4423_v32  ;;  %2316 = vmatprep.subr.bf16.mxu1 %v4426_v1 }
 0x191   : > { %2512 = vmatprep.subr.bf16.mxu0 %v4427_v49 }
 0x193   : > { %2318 = vmatpush1.bf16.msra.mxu1 %v4430_v8 }
 0x194   : > { %2514 = vmatpush1.bf16.msra.mxu0 %v4431_v46  ;;  %2320 = vmatprep.subr.bf16.mxu1 %v4434_v11 }
 0x195   : > { %2516 = vmatprep.subr.bf16.mxu0 %v4435_v27 }
 0x197   : > { %2322 = vmatpush1.bf16.msra.mxu1 %v4438_v35 }
 0x198   : > { %2518 = vmatpush1.bf16.msra.mxu0 %v4439_v39  ;;  %2324 = vmatprep.subr.bf16.mxu1 %v4442_v53 }
 0x19b   : > { %1985 = vmatmul.mubr.f32.vlgmr.msra.gmra.mrb[0].mxu0 %v3758_v60  ;;  %2326 = vmatpush1.bf16.msra.mxu1 %v4445_v59 }
 0x19e   : > { %1442 = vmatmul.mubr.f32.vlgmr.msra.gmra.mrb[0].mxu1 %v4446_v9 }
 0x1a1   : > { %v705_v48 = vpop.permute.xlu1 %704 }
 0x26e   : > { %v1986_v17 = vpop.f32.mrb[0].mxu0 }
 0x26f   : > { %v1988_v44 = vpop.f32.mrb[1].mxu0 }
 0x271   : > { %v1443_v20 = vpop.f32.mrb[0].mxu1 }
 0x272   : > { %v2519_v37 = vadd.f32 %v1443_v20, %v705_v48  ;;  %v1445_v43 = vpop.f32.mrb[1].mxu1 }
 0x273   : > { %v2521_v36 = vadd.f32 %v1445_v43, %v705_v48 }
 0x274   : > { %v2520_v13 = vadd.f32 %v2519_v37, %v1986_v17 }
 0x275   : > { %v2522_v60 = vadd.f32 %v2521_v36, %v1988_v44 }
 0x277   : > { %v1993_v18 = vcombine.low %v2520_v13, %v2522_v60 }
 0x279   : > { %1995 = vst [vmem:[%s229_s29] sm:$0xff] %v1993_v18 }
 0x27a   : > { %2651 = shalt.err (!%p2648_p5)
}
 0x27b   : > { %s2652_s21 = scalar_lea.hbm %s3989_s9, 128  ;;  %s2656_s12 = scalar_lea.hbm %s4040_s4, 256 }
 0x27c   : > { %p2653_p6 = scmp.ne.s32.totalorder %s3989_s9, %s2652_s21  ;;  %p2657_p10 = scmp.lt.u32.totalorder %s3989_s9, %s4040_s4 }
 0x27d   : > { %p2658_p11 = scmp.lt.u32.totalorder %s2656_s12, %s2652_s21  ;;  %p2660_p13 = scmp.lt.u32.totalorder %s2652_s21, %s3989_s9 }
 0x27e   : > { %p2654_p7 = pnand %p2653_p6, %p2811_p4 }
 0x27f   : > { %p2659_p12 = por %p2658_p11, %p2657_p10 }
 0x280   : > { %p2655_p9 = pneg %p2654_p7 }
 0x281   : > { %p2661_p0 = por %p2660_p13, %p2659_p12 }
 0x283   : > { %p2662_p1 = pnand %p2661_p0, %p2655_p9 }
 0x285   : > { %2665 = shalt.err (!%p2662_p1)
}
 0x286   : > { %2531 = dma.vmem_to_hbm [thread:$0]  (%p2811_p4), %s3991_s30, 128, %s3989_s9, %s1997_s10  }
 0x287 PF: > { %p2537_p2 = scmp.ge.s32.totalorder %s2716_s20, 2  ;;  %s2025_s26 = sand.u32 1, %s2696_s15  }
 0x288   : > { %s2026_s29 = scalar_lea.sflag [#allocation3], %s2025_s26 }
 0x289   : > { %p2534_p3 = pnand %p2537_p2, %p2818_p8 }
 0x28b   : > { %2691 = dma.done.wait (!%p2534_p3), %s2026_s29, 128  }
 0x28c   : > { %2693 = vsyncadd (!%p2534_p3), %s2026_s29, 4294967168  ;;  %s17_s20 = sadd.s32 1, %s2716_s20   ;;  %s4447_s15 = smov %s2700_s16 }
 0x28d   : > { %p14_p5 = scmp.ge.s32.totalorder %s17_s20, 4   ;;  %s4448_s16 = smov %s2704_s17 }
 0x28e   : > { %s4449_s17 = smov %s2824_s28  ;;  %s4450_s18 = smov %s2712_s19 }
 0x28f   : > { %s4451_s19 = smov %s4453_s23  ;;  %16 = sbr.rel (!%p14_p5) target bundleno = 4 (0x4), region = 81 }
 0x296   :  { %2031 = vsyncpa [#allocation3], 1 }
 0x297   :  { %2033 = vsyncpa [#allocation3 + $0x1], 1 }

</bundles_post_ra>
